<compile_context>
chip_gen: v7x
topology: tpu7x:2x2x1
jax: 0.10.0
libtpu: 0.0.40
codegen_flags: <defaults>
</compile_context>

<pallas_src>
import jax
import jax.numpy as jnp
from jax.experimental import pallas as pl
from jax.experimental.pallas import tpu as pltpu

_SUBLANE = 8  # batch block must be a multiple of this (or equal full extent)


def _round_up(x, m):
    return ((x + m - 1) // m) * m


def _mlp_kernel(y_ref, *refs):
    """Fused MLP on one (block_b, y_dim) row tile.

    refs = (W0, b0, W1, b1, ..., W_last, b_last, out_ref)
    Hidden layers: tanh. Output layer: relu. Accumulation in f32.
    """
    out_ref = refs[-1]
    params = refs[:-1]
    n_total = len(params) // 2

    h = y_ref[...]                                   # f32 or bf16 (matches weights)
    for li in range(n_total):
        w = params[2 * li][...]                      # (in_d, out_d), f32 or bf16
        b = params[2 * li + 1][...]                  # (1, out_d), f32
        h = jnp.dot(h.astype(w.dtype), w,
                    preferred_element_type=jnp.float32) + b
        if li < n_total - 1:
            h = jnp.tanh(h)                          # hidden activation (EUP, f32)
        else:
            h = jnp.maximum(h, 0.0)                  # output activation = relu
    out_ref[...] = h.astype(out_ref.dtype)


def prepare_params(weights, biases, param_dtype=jnp.float32):
    """One-time parameter packing/casting (hoisted out of the per-call path)."""
    ws = [jnp.asarray(w, param_dtype) for w in weights]
    bs = [jnp.asarray(b, jnp.float32).reshape(1, -1) for b in biases]
    return ws, bs


@jax.jit
def mlpc_forward(y, weights, biases):
    """Pallas implementation of MLPCModel.forward (including the final torch.squeeze).

    y:        (B, y_dim) array (a 1-D y is treated as a single row, like predict())
    weights:  list of (in_dim, out_dim) arrays (f32 or bf16, from prepare_params)
    biases:   list of (1, out_dim) f32 arrays       (from prepare_params)
    """
    compute_dtype = weights[0].dtype
    y = jnp.asarray(y)
    if y.ndim == 1:
        y = y[None]
    y = y.astype(compute_dtype)                      # bf16 path: halves the y DMA
    B, y_dim = y.shape
    dims = [y_dim] + [int(w.shape[1]) for w in weights]
    z_dim = dims[-1]

    param_bytes = (sum(int(w.size) * w.dtype.itemsize for w in weights)
                   + sum(int(b.size) * 4 for b in biases))

    # ---- batch tile: target a 2-step grid, multiple of 8, bounded by VMEM budget ----
    target_grid = 2 if B >= 2 * _SUBLANE else 1
    block_b = _round_up(pl.cdiv(B, target_grid), _SUBLANE)

    def _vmem_bytes(bb):
        io = bb * y_dim * jnp.dtype(compute_dtype).itemsize + bb * z_dim * 4
        act = bb * max(dims) * 4                              # f32 activations
        if compute_dtype != jnp.float32:
            act += bb * max(dims) * jnp.dtype(compute_dtype).itemsize  # MXU operand copy
        return 2 * io + 2 * param_bytes + act                 # 2x = double buffering

    _VMEM_BUDGET = 12 * 1024 * 1024    # safe under v5e's 16 MiB scoped-VMEM default
    while block_b > _SUBLANE and _vmem_bytes(block_b) > _VMEM_BUDGET:
        block_b = max(_SUBLANE, _round_up(block_b // 2, _SUBLANE))

    # ---- pad batch so the grid covers every row (padded rows sliced off below) ----
    B_pad = _round_up(B, block_b)
    y_pad = jnp.pad(y, ((0, B_pad - B), (0, 0)))
    grid = (B_pad // block_b,)

    # Full-extent feature dims everywhere: no lane padding, no inflated HBM traffic.
    in_specs = [pl.BlockSpec((block_b, y_dim), lambda i: (i, 0))]
    args = [y_pad]
    for w, b in zip(weights, biases):
        # constant index_map: parameters stay resident across all grid steps
        in_specs.append(pl.BlockSpec(w.shape, lambda i: (0, 0)))
        in_specs.append(pl.BlockSpec(b.shape, lambda i: (0, 0)))
        args.extend([w, b])

    # Advisory cost estimate from the REAL (unpadded) dims.
    flops = 2 * B * sum(a * c for a, c in zip(dims[:-1], dims[1:]))
    transcendentals = B * sum(dims[1:-1])
    bytes_accessed = (B * y_dim * jnp.dtype(compute_dtype).itemsize
                      + param_bytes + B * z_dim * 4)

    out = pl.pallas_call(
        _mlp_kernel,
        out_shape=jax.ShapeDtypeStruct((B_pad, z_dim), jnp.float32),
        grid_spec=pltpu.PrefetchScalarGridSpec(
            num_scalar_prefetch=0,
            grid=grid,
            in_specs=in_specs,
            out_specs=pl.BlockSpec((block_b, z_dim), lambda i: (i, 0)),
        ),
        compiler_params=pltpu.CompilerParams(
            dimension_semantics=("parallel",),
        ),
        cost_estimate=pl.CostEstimate(
            flops=int(flops),
            transcendentals=int(transcendentals),
            bytes_accessed=int(bytes_accessed),
        ),
    )(*args)

    # slice away batch padding, then torch.squeeze equivalent
    # (like torch.squeeze, this drops ALL size-1 dims, incl. batch when B==1).
    return jnp.squeeze(out[:B])


def init_mlp_params(key, y_dim, z_dim, n_layers, layer_size):
    """Deterministic parameter init matching build_mlp layer shapes:
    n_layers hidden Linear(in, layer_size) layers, then Linear(layer_size, z_dim)."""
    dims = [y_dim] + [layer_size] * n_layers + [z_dim]
    weights, biases = [], []
    for li in range(len(dims) - 1):
        key, wk, bk = jax.random.split(key, 3)
        scale = 1.0 / jnp.sqrt(jnp.float32(dims[li]))
        w = jax.random.uniform(wk, (dims[li], dims[li + 1]),
                               minval=-scale, maxval=scale, dtype=jnp.float32)
        b = jax.random.uniform(bk, (1, dims[li + 1]),
                               minval=-scale, maxval=scale, dtype=jnp.float32)
        weights.append(w)
        biases.append(b)
    return weights, biases


def reference_forward(y, weights, biases):
    h = y
    n_total = len(weights)
    for li, (w, b) in enumerate(zip(weights, biases)):
        h = h @ w + b
        h = jnp.tanh(h) if li < n_total - 1 else jnp.maximum(h, 0.0)
    return jnp.squeeze(h)


if __name__ == "__main__":
    # Shapes consistent with the module: MLP on (batch, y_dim) vectors.
    # batch is intentionally NOT a multiple of the block size to exercise padding.
    batch, y_dim, z_dim = 1000, 16, 4
    n_layers, layer_size = 2, 32

    key = jax.random.PRNGKey(0)
    key, yk = jax.random.split(key)
    y = jax.random.normal(yk, (batch, y_dim), dtype=jnp.float32)
    weights, biases = init_mlp_params(key, y_dim, z_dim, n_layers, layer_size)
    z_ref = reference_forward(y, weights, biases)

    # f32-weight path: exact match to the reference.
    w_f32, b_f32 = prepare_params(weights, biases, jnp.float32)
    z_pred = jax.block_until_ready(mlpc_forward(y, w_f32, b_f32))
    assert z_pred.shape == z_ref.shape
    assert jnp.allclose(z_pred, z_ref, atol=1e-5, rtol=1e-5)

    # bf16-weight path (MXU-friendly, f32 accumulation): looser tolerance.
    w_bf16, b_bf16 = prepare_params(weights, biases, jnp.bfloat16)
    z_bf16 = jax.block_until_ready(mlpc_forward(y, w_bf16, b_bf16))
    assert z_bf16.shape == z_ref.shape
    assert jnp.allclose(z_bf16, z_ref, atol=5e-2, rtol=5e-2)

    # Small / odd batch sanity check (padding + grid=1 + squeeze path).
    y_small = y[:3]
    z_small = jax.block_until_ready(mlpc_forward(y_small, w_f32, b_f32))
    assert jnp.allclose(z_small, reference_forward(y_small, weights, biases),
                        atol=1e-5, rtol=1e-5)

    # TODO(synk): training paths (initial_fit/update, Adam/SGD, MSELoss, LANCER loss,
    # save) are host-side optimizer logic and are not part of the forward kernel.
    print("KERNEL_OK")
</pallas_src>

<mosaic_0001>
module attributes {stable_mosaic.version = 11 : i64} {
  func.func @_mlp_kernel(%arg0: i32, %arg1: memref<504x16xf32, #tpu.memory_space<vmem>>, %arg2: memref<16x32xf32, #tpu.memory_space<vmem>>, %arg3: memref<1x32xf32, #tpu.memory_space<vmem>>, %arg4: memref<32x32xf32, #tpu.memory_space<vmem>>, %arg5: memref<1x32xf32, #tpu.memory_space<vmem>>, %arg6: memref<32x4xf32, #tpu.memory_space<vmem>>, %arg7: memref<1x4xf32, #tpu.memory_space<vmem>>, %arg8: memref<504x4xf32, #tpu.memory_space<vmem>>) attributes {dimension_semantics = [#tpu.dimension_semantics<parallel>], iteration_bounds = array<i64: 2>, scalar_prefetch = 0 : i64, scratch_operands = 0 : i64, tpu.core_type = #tpu.core_type<tc>, window_params = [{transform_indices = @transform_0, window_bounds = array<i64: 504, 16>}, {pipeline_mode = #tpu.pipeline_mode<synchronous>, transform_indices = @transform_1, window_bounds = array<i64: 16, 32>}, {pipeline_mode = #tpu.pipeline_mode<synchronous>, transform_indices = @transform_2, window_bounds = array<i64: 1, 32>}, {pipeline_mode = #tpu.pipeline_mode<synchronous>, transform_indices = @transform_3, window_bounds = array<i64: 32, 32>}, {pipeline_mode = #tpu.pipeline_mode<synchronous>, transform_indices = @transform_4, window_bounds = array<i64: 1, 32>}, {pipeline_mode = #tpu.pipeline_mode<synchronous>, transform_indices = @transform_5, window_bounds = array<i64: 32, 4>}, {pipeline_mode = #tpu.pipeline_mode<synchronous>, transform_indices = @transform_6, window_bounds = array<i64: 1, 4>}, {transform_indices = @transform_7, window_bounds = array<i64: 504, 4>}]} {
    %c0 = arith.constant 0 : index
    %c0_0 = arith.constant 0 : index
    %0 = vector.load %arg1[%c0, %c0_0] : memref<504x16xf32, #tpu.memory_space<vmem>>, vector<504x16xf32>
    %c0_1 = arith.constant 0 : index
    %c0_2 = arith.constant 0 : index
    %1 = vector.load %arg2[%c0_1, %c0_2] : memref<16x32xf32, #tpu.memory_space<vmem>>, vector<16x32xf32>
    %c0_3 = arith.constant 0 : index
    %c0_4 = arith.constant 0 : index
    %2 = vector.load %arg3[%c0_3, %c0_4] : memref<1x32xf32, #tpu.memory_space<vmem>>, vector<1x32xf32>
    %cst = arith.constant dense<0.000000e+00> : vector<504x32xf32>
    %3 = tpu.matmul %0, %1, %cst {dimension_numbers = #tpu.dot_dimension_numbers<[1], [0], [0], [1], [0, 0, 1, 1], [], []>} : vector<504x16xf32>, vector<16x32xf32>, vector<504x32xf32> -> vector<504x32xf32>
    %4 = vector.broadcast %2 : vector<1x32xf32> to vector<504x32xf32>
    %5 = arith.addf %3, %4 : vector<504x32xf32>
    %6 = math.tanh %5 : vector<504x32xf32>
    %c0_5 = arith.constant 0 : index
    %c0_6 = arith.constant 0 : index
    %7 = vector.load %arg4[%c0_5, %c0_6] : memref<32x32xf32, #tpu.memory_space<vmem>>, vector<32x32xf32>
    %c0_7 = arith.constant 0 : index
    %c0_8 = arith.constant 0 : index
    %8 = vector.load %arg5[%c0_7, %c0_8] : memref<1x32xf32, #tpu.memory_space<vmem>>, vector<1x32xf32>
    %cst_9 = arith.constant dense<0.000000e+00> : vector<504x32xf32>
    %9 = tpu.matmul %6, %7, %cst_9 {dimension_numbers = #tpu.dot_dimension_numbers<[1], [0], [0], [1], [0, 0, 1, 1], [], []>} : vector<504x32xf32>, vector<32x32xf32>, vector<504x32xf32> -> vector<504x32xf32>
    %10 = vector.broadcast %8 : vector<1x32xf32> to vector<504x32xf32>
    %11 = arith.addf %9, %10 : vector<504x32xf32>
    %12 = math.tanh %11 : vector<504x32xf32>
    %c0_10 = arith.constant 0 : index
    %c0_11 = arith.constant 0 : index
    %13 = vector.load %arg6[%c0_10, %c0_11] : memref<32x4xf32, #tpu.memory_space<vmem>>, vector<32x4xf32>
    %c0_12 = arith.constant 0 : index
    %c0_13 = arith.constant 0 : index
    %14 = vector.load %arg7[%c0_12, %c0_13] : memref<1x4xf32, #tpu.memory_space<vmem>>, vector<1x4xf32>
    %cst_14 = arith.constant dense<0.000000e+00> : vector<504x4xf32>
    %15 = tpu.matmul %12, %13, %cst_14 {dimension_numbers = #tpu.dot_dimension_numbers<[1], [0], [0], [1], [0, 0, 1, 1], [], []>} : vector<504x32xf32>, vector<32x4xf32>, vector<504x4xf32> -> vector<504x4xf32>
    %16 = vector.broadcast %14 : vector<1x4xf32> to vector<504x4xf32>
    %17 = arith.addf %15, %16 : vector<504x4xf32>
    %cst_15 = arith.constant 0.000000e+00 : f32
    %18 = vector.broadcast %cst_15 : f32 to vector<504x4xf32>
    %19 = arith.maximumf %17, %18 : vector<504x4xf32>
    %c0_16 = arith.constant 0 : index
    %c0_17 = arith.constant 0 : index
    %20 = vector.load %arg8[%c0_16, %c0_17] : memref<504x4xf32, #tpu.memory_space<vmem>>, vector<504x4xf32>
    tpu.vector_store %arg8[%c0_16, %c0_17], %19 {strides = array<i32>} : memref<504x4xf32, #tpu.memory_space<vmem>>, vector<504x4xf32>,
    return
  }
  func.func @transform_0(%arg0: i32) -> (i32, i32) {
    %c0_i32 = arith.constant 0 : i32
    %c0_i32_0 = arith.constant 0 : i32
    return %arg0, %c0_i32 : i32, i32
  }
  func.func @transform_1(%arg0: i32) -> (i32, i32) {
    %c0_i32 = arith.constant 0 : i32
    %c0_i32_0 = arith.constant 0 : i32
    %c0_i32_1 = arith.constant 0 : i32
    return %c0_i32, %c0_i32_0 : i32, i32
  }
  func.func @transform_2(%arg0: i32) -> (i32, i32) {
    %c0_i32 = arith.constant 0 : i32
    %c0_i32_0 = arith.constant 0 : i32
    %c0_i32_1 = arith.constant 0 : i32
    return %c0_i32, %c0_i32_0 : i32, i32
  }
  func.func @transform_3(%arg0: i32) -> (i32, i32) {
    %c0_i32 = arith.constant 0 : i32
    %c0_i32_0 = arith.constant 0 : i32
    %c0_i32_1 = arith.constant 0 : i32
    return %c0_i32, %c0_i32_0 : i32, i32
  }
  func.func @transform_4(%arg0: i32) -> (i32, i32) {
    %c0_i32 = arith.constant 0 : i32
    %c0_i32_0 = arith.constant 0 : i32
    %c0_i32_1 = arith.constant 0 : i32
    return %c0_i32, %c0_i32_0 : i32, i32
  }
  func.func @transform_5(%arg0: i32) -> (i32, i32) {
    %c0_i32 = arith.constant 0 : i32
    %c0_i32_0 = arith.constant 0 : i32
    %c0_i32_1 = arith.constant 0 : i32
    return %c0_i32, %c0_i32_0 : i32, i32
  }
  func.func @transform_6(%arg0: i32) -> (i32, i32) {
    %c0_i32 = arith.constant 0 : i32
    %c0_i32_0 = arith.constant 0 : i32
    %c0_i32_1 = arith.constant 0 : i32
    return %c0_i32, %c0_i32_0 : i32, i32
  }
  func.func @transform_7(%arg0: i32) -> (i32, i32) {
    %c0_i32 = arith.constant 0 : i32
    %c0_i32_0 = arith.constant 0 : i32
    return %arg0, %c0_i32 : i32, i32
  }
}

</mosaic_0001>

<bundles_post_ra>
// kernel: mlpc_forward.1
= control target key start
LH: loop header
LB: loop body
LE: loop exit
PB: predicated region body
PF: predicated region fallthrough
CT: control target
= control target key end

     0   :  { %s3712_s24 = smov 0   ;;  %s4829_s0 = inlined_call_operand.vmem [shape: f32[1008,16], index: 0, kind: input, shape index: {}]   ;;  %s4830_s1 = inlined_call_operand.vmem [shape: f32[16,32], index: 1, kind: input, shape index: {}]   ;;  %s4831_s2 = inlined_call_operand.vmem [shape: f32[1,32], index: 2, kind: input, shape index: {}]   ;;  %s4832_s3 = inlined_call_operand.vmem [shape: f32[32,32], index: 3, kind: input, shape index: {}]   ;;  %s4833_s4 = inlined_call_operand.vmem [shape: f32[1,32], index: 4, kind: input, shape index: {}]   ;;  %s4834_s5 = inlined_call_operand.vmem [shape: f32[32,4], index: 5, kind: input, shape index: {}]   ;;  %s4835_s6 = inlined_call_operand.vmem [shape: f32[1,4], index: 6, kind: input, shape index: {}]   ;;  %s4836_s7 = inlined_call_operand.vmem [shape: f32[1008,4], index: 7, kind: output, shape index: {}]  }
   0x1 LB: > { %s2394_s25 = sadd.s32 4294967295, %s3667_s24   ;;  %p2398_p0 = scmp.ge.s32.totalorder %s3667_s24, 1  ;;  %s3667_s24 = sphi %s3712_s24, %s17_s24  }
   0x2   : > { %p238_p1 = scmp.lt.s32.totalorder %s3667_s24, 3 }
   0x4   : > { %p239_p2 = pnand %p2398_p0, %p238_p1 }
   0x5   : > { %v345_v0 = vld [vmem:[%s4830_s1] sm:$0xff] (!%p239_p2)  ;;  %v346_v1 = vld [vmem:[%s4830_s1 + $0x8] sm:$0xff] (!%p239_p2)  ;;  %s270_s30 = smul.u32 (!%p239_p2), 63, %s2394_s25  ;;  %v3669_v2 = vmov (!%p239_p2), 0.0|0.0   ;;  %vm3670_vm0 = vmmov (!%p239_p2), 0   ;;  %v3671_v4 = vmov (!%p239_p2), 0.0  }
   0x6   : > { %242 = sbr.rel (%p239_p2) target bundleno = 932 (0x3a4), region = 48  ;;  %3381 = vmatprep.subr.bf16.mxu0 (!%p239_p2), %v3669_v2  ;;  %v3382_v3 = vpack.c.bf16 (!%p239_p2), %v346_v1, %v345_v0  ;;  %2798 = vmatprep.mubr.msk.f32.mxu0 (!%p239_p2), %vm3670_vm0, %v3671_v4  ;;  %vm354_vm1 = vcmask (!%p239_p2), 130048   ;;  %v987_v7 = vld [vmem:[%s4832_s3] sm:$0xff] (!%p239_p2)  ;;  %v988_v8 = vld [vmem:[%s4832_s3 + $0x8] sm:$0xff] (!%p239_p2)  ;;  %v989_v12 = vld [vmem:[%s4832_s3 + $0x10] sm:$0xff] (!%p239_p2)  ;;  %vm998_vm2 = vcmask (!%p239_p2), 261120  }
   0x7   : > { %p271_p3 = scmp.lt.s32.totalorder (!%p239_p2), %s270_s30, 125  ;;  %3396 = vmatprep.subr.bf16.mxu1 (!%p239_p2), %v3669_v2  ;;  %2894 = vmatprep.mubr.msk.f32.mxu1 (!%p239_p2), %vm3670_vm0, %v3671_v4  ;;  %v3385_v10 = vpack.c.bf16 (!%p239_p2), %v988_v8, %v987_v7  ;;  %v990_v13 = vld [vmem:[%s4832_s3 + $0x18] sm:$0xff] (!%p239_p2)  ;;  %vm2274_vm3 = vcmask (!%p239_p2), 31744  }
   0x8   : > { %3383 = vmatpush3.bf16.msra.mxu0 (!%p239_p2), %v3382_v3  ;;  %3397 = vmatpush3.bf16.msra.mxu1 (!%p239_p2), %v3382_v3  ;;  %v3388_v16 = vpack.c.bf16 (!%p239_p2), %v990_v13, %v989_v12  ;;  %v1631_v12 = vld [vmem:[%s4834_s5] sm:$0xff] (!%p239_p2)  ;;  %v1632_v13 = vld [vmem:[%s4834_s5 + $0x8] sm:$0xff] (!%p239_p2) }
   0x9   : > { %3384 = vmatprep.subr.bf16.mxu1 (!%p239_p2), %v3669_v2  ;;  %3390 = vmatprep.subr.bf16.mxu0 (!%p239_p2), %v3669_v2 }
   0xd   : > { %s4838_s30 = smov (!%p271_p3, %s270_s30), 125 }
   0xe   : > { %s2399_s8 = sshll.u32 %s4838_s30, 3 }
   0xf   : > { %s3742_s11 = scalar_lea.vmem %s4829_s0, %s2399_s8  ;;  %s4603_s16 = scalar_lea.vmem %s4836_s7, %s2399_s8 }
  0x10   : > { %v282_v5 = vld [vmem:[%s3742_s11] sm:$0xff]  ;;  %v283_v6 = vld [vmem:[%s3742_s11 + $0x8] sm:$0xff]  ;;  %v284_v9 = vld [vmem:[%s3742_s11 + $0x10] sm:$0xff] }
  0x11   : > { %2799 = vmatmul.mubr.msk.f32.vlgmr.msra.gmra.mrb[0].mxu0 %vm354_vm1, %v282_v5  ;;  %v314_v11 = vld [vmem:[%s3742_s11 + $0x100] sm:$0xff]  ;;  %v285_v14 = vld [vmem:[%s3742_s11 + $0x18] sm:$0xff]  ;;  %v315_v15 = vld [vmem:[%s3742_s11 + $0x108] sm:$0xff] }
  0x12   : > { %2801 = vmatprep.mubr.msk.f32.mxu0 %vm3670_vm0, %v3671_v4  ;;  %2895 = vmatmul.mubr.msk.f32.vlgmr.msra.gmra.mrb[0].mxu1 %vm354_vm1, %v314_v11  ;;  %v286_v17 = vld [vmem:[%s3742_s11 + $0x20] sm:$0xff]  ;;  %v316_v18 = vld [vmem:[%s3742_s11 + $0x110] sm:$0xff]  ;;  %v287_v19 = vld [vmem:[%s3742_s11 + $0x28] sm:$0xff] }
  0x13   : > { %3386 = vmatpush3.bf16.msra.mxu1 %v3385_v10  ;;  %2897 = vmatprep.mubr.msk.f32.mxu1 %vm3670_vm0, %v3671_v4  ;;  %v317_v20 = vld [vmem:[%s3742_s11 + $0x118] sm:$0xff]  ;;  %v288_v21 = vld [vmem:[%s3742_s11 + $0x30] sm:$0xff]  ;;  %v318_v22 = vld [vmem:[%s3742_s11 + $0x120] sm:$0xff] }
  0x14   : > { %3387 = vmatprep.subr.bf16.mxu1 %v3669_v2  ;;  %v289_v23 = vld [vmem:[%s3742_s11 + $0x38] sm:$0xff]  ;;  %v319_v24 = vld [vmem:[%s3742_s11 + $0x128] sm:$0xff]  ;;  %v290_v25 = vld [vmem:[%s3742_s11 + $0x40] sm:$0xff] }
  0x15   : > { %2802 = vmatmul.mubr.msk.f32.gmra.mrb[2].mxu0 %vm354_vm1, %v283_v6  ;;  %v320_v26 = vld [vmem:[%s3742_s11 + $0x130] sm:$0xff]  ;;  %v291_v27 = vld [vmem:[%s3742_s11 + $0x48] sm:$0xff]  ;;  %v321_v28 = vld [vmem:[%s3742_s11 + $0x138] sm:$0xff] }
  0x16   : > { %2804 = vmatprep.mubr.msk.f32.mxu0 %vm3670_vm0, %v3671_v4  ;;  %2898 = vmatmul.mubr.msk.f32.gmra.mrb[2].mxu1 %vm354_vm1, %v315_v15  ;;  %v292_v29 = vld [vmem:[%s3742_s11 + $0x50] sm:$0xff]  ;;  %v322_v30 = vld [vmem:[%s3742_s11 + $0x140] sm:$0xff]  ;;  %v293_v31 = vld [vmem:[%s3742_s11 + $0x58] sm:$0xff] }
  0x17   : > { %2900 = vmatprep.mubr.msk.f32.mxu1 %vm3670_vm0, %v3671_v4  ;;  %3389 = vmatpush3.bf16.msra.mxu1 %v3388_v16  ;;  %v323_v32 = vld [vmem:[%s3742_s11 + $0x148] sm:$0xff]  ;;  %v294_v33 = vld [vmem:[%s3742_s11 + $0x60] sm:$0xff]  ;;  %v324_v34 = vld [vmem:[%s3742_s11 + $0x150] sm:$0xff] }
  0x18   : > { %v295_v35 = vld [vmem:[%s3742_s11 + $0x68] sm:$0xff]  ;;  %v325_v36 = vld [vmem:[%s3742_s11 + $0x158] sm:$0xff]  ;;  %v296_v37 = vld [vmem:[%s3742_s11 + $0x70] sm:$0xff] }
  0x19   : > { %2805 = vmatmul.mubr.msk.f32.gmra.mrb[4].mxu0 %vm354_vm1, %v284_v9  ;;  %v326_v38 = vld [vmem:[%s3742_s11 + $0x160] sm:$0xff]  ;;  %v297_v39 = vld [vmem:[%s3742_s11 + $0x78] sm:$0xff]  ;;  %v327_v40 = vld [vmem:[%s3742_s11 + $0x168] sm:$0xff] }
  0x1a   : > { %2807 = vmatprep.mubr.msk.f32.mxu0 %vm3670_vm0, %v3671_v4  ;;  %2901 = vmatmul.mubr.msk.f32.gmra.mrb[4].mxu1 %vm354_vm1, %v316_v18  ;;  %v298_v41 = vld [vmem:[%s3742_s11 + $0x80] sm:$0xff]  ;;  %v328_v42 = vld [vmem:[%s3742_s11 + $0x170] sm:$0xff]  ;;  %v299_v43 = vld [vmem:[%s3742_s11 + $0x88] sm:$0xff] }
  0x1b   : > { %2903 = vmatprep.mubr.msk.f32.mxu1 %vm3670_vm0, %v3671_v4  ;;  %v329_v44 = vld [vmem:[%s3742_s11 + $0x178] sm:$0xff]  ;;  %v300_v45 = vld [vmem:[%s3742_s11 + $0x90] sm:$0xff]  ;;  %v330_v46 = vld [vmem:[%s3742_s11 + $0x180] sm:$0xff] }
  0x1c   : > { %v301_v47 = vld [vmem:[%s3742_s11 + $0x98] sm:$0xff]  ;;  %v331_v48 = vld [vmem:[%s3742_s11 + $0x188] sm:$0xff]  ;;  %v302_v49 = vld [vmem:[%s3742_s11 + $0xa0] sm:$0xff] }
  0x1d   : > { %2808 = vmatmul.mubr.msk.f32.gmra.mrb[6].mxu0 %vm354_vm1, %v285_v14  ;;  %v332_v50 = vld [vmem:[%s3742_s11 + $0x190] sm:$0xff]  ;;  %v303_v51 = vld [vmem:[%s3742_s11 + $0xa8] sm:$0xff]  ;;  %v333_v52 = vld [vmem:[%s3742_s11 + $0x198] sm:$0xff]  ;;  %v3391_v14 = vpack.c.bf16 %v1632_v13, %v1631_v12 }
  0x1e   : > { %2810 = vmatprep.mubr.msk.f32.mxu0 %vm3670_vm0, %v3671_v4  ;;  %2904 = vmatmul.mubr.msk.f32.gmra.mrb[6].mxu1 %vm354_vm1, %v317_v20  ;;  %v304_v53 = vld [vmem:[%s3742_s11 + $0xb0] sm:$0xff]  ;;  %v334_v54 = vld [vmem:[%s3742_s11 + $0x1a0] sm:$0xff]  ;;  %v305_v55 = vld [vmem:[%s3742_s11 + $0xb8] sm:$0xff] }
  0x1f   : > { %2906 = vmatprep.mubr.msk.f32.mxu1 %vm3670_vm0, %v3671_v4  ;;  %v335_v56 = vld [vmem:[%s3742_s11 + $0x1a8] sm:$0xff]  ;;  %v306_v57 = vld [vmem:[%s3742_s11 + $0xc0] sm:$0xff]  ;;  %v336_v58 = vld [vmem:[%s3742_s11 + $0x1b0] sm:$0xff]  ;;  %3392 = vmatpush3.bf16.msra.mxu0 %v3391_v14 }
  0x20   : > { %v307_v59 = vld [vmem:[%s3742_s11 + $0xc8] sm:$0xff]  ;;  %v337_v60 = vld [vmem:[%s3742_s11 + $0x1b8] sm:$0xff]  ;;  %v308_v61 = vld [vmem:[%s3742_s11 + $0xd0] sm:$0xff]  ;;  %3393 = vmatprep.subr.bf16.mxu0 %v3669_v2 }
  0x21   : > { %2811 = vmatmul.mubr.msk.f32.gmra.mrb[8].mxu0 %vm354_vm1, %v286_v17  ;;  %v338_v62 = vld [vmem:[%s3742_s11 + $0x1c0] sm:$0xff]  ;;  %v309_v63 = vld [vmem:[%s3742_s11 + $0xd8] sm:$0xff]  ;;  %v339_v0 = vld [vmem:[%s3742_s11 + $0x1c8] sm:$0xff] }
  0x22   : > { %2813 = vmatprep.mubr.msk.f32.mxu0 %vm3670_vm0, %v3671_v4  ;;  %2907 = vmatmul.mubr.msk.f32.gmra.mrb[8].mxu1 %vm354_vm1, %v318_v22  ;;  %v310_v1 = vld [vmem:[%s3742_s11 + $0xe0] sm:$0xff]  ;;  %v340_v3 = vld [vmem:[%s3742_s11 + $0x1d0] sm:$0xff]  ;;  %v311_v5 = vld [vmem:[%s3742_s11 + $0xe8] sm:$0xff] }
  0x23   : > { %2909 = vmatprep.mubr.msk.f32.mxu1 %vm3670_vm0, %v3671_v4  ;;  %v341_v6 = vld [vmem:[%s3742_s11 + $0x1d8] sm:$0xff]  ;;  %v312_v7 = vld [vmem:[%s3742_s11 + $0xf0] sm:$0xff]  ;;  %v342_v8 = vld [vmem:[%s3742_s11 + $0x1e0] sm:$0xff] }
  0x24   : > { %v313_v9 = vld [vmem:[%s3742_s11 + $0xf8] sm:$0xff]  ;;  %v343_v10 = vld [vmem:[%s3742_s11 + $0x1e8] sm:$0xff]  ;;  %v344_v11 = vld [vmem:[%s3742_s11 + $0x1f0] sm:$0xff] }
  0x25   : > { %2814 = vmatmul.mubr.msk.f32.gmra.mrb[10].mxu0 %vm354_vm1, %v287_v19  ;;  %v4019_v15 = vld [vmem:[%s4831_s2] ss:$0 sm:$0xff] }
  0x26   : > { %2816 = vmatprep.mubr.msk.f32.mxu0 %vm3670_vm0, %v3671_v4  ;;  %2910 = vmatmul.mubr.msk.f32.gmra.mrb[10].mxu1 %vm354_vm1, %v319_v24 }
  0x27   : > { %2912 = vmatprep.mubr.msk.f32.mxu1 %vm3670_vm0, %v3671_v4 }
  0x29   : > { %2817 = vmatmul.mubr.msk.f32.gmra.mrb[12].mxu0 %vm354_vm1, %v288_v21 }
  0x2a   : > { %2819 = vmatprep.mubr.msk.f32.mxu0 %vm3670_vm0, %v3671_v4  ;;  %2913 = vmatmul.mubr.msk.f32.gmra.mrb[12].mxu1 %vm354_vm1, %v320_v26 }
  0x2b   : > { %2915 = vmatprep.mubr.msk.f32.mxu1 %vm3670_vm0, %v3671_v4 }
  0x2d   : > { %2820 = vmatmul.mubr.msk.f32.gmra.mrb[14].mxu0 %vm354_vm1, %v289_v23 }
  0x2e   : > { %2822 = vmatprep.mubr.msk.f32.mxu0 %vm3670_vm0, %v3671_v4  ;;  %2916 = vmatmul.mubr.msk.f32.gmra.mrb[14].mxu1 %vm354_vm1, %v321_v28 }
  0x2f   : > { %2918 = vmatprep.mubr.msk.f32.mxu1 %vm3670_vm0, %v3671_v4 }
  0x31   : > { %2823 = vmatmul.mubr.msk.f32.gmra.mrb[16].mxu0 %vm354_vm1, %v290_v25 }
  0x32   : > { %2825 = vmatprep.mubr.msk.f32.mxu0 %vm3670_vm0, %v3671_v4  ;;  %2919 = vmatmul.mubr.msk.f32.gmra.mrb[16].mxu1 %vm354_vm1, %v322_v30 }
  0x33   : > { %2921 = vmatprep.mubr.msk.f32.mxu1 %vm3670_vm0, %v3671_v4 }
  0x35   : > { %2826 = vmatmul.mubr.msk.f32.gmra.mrb[18].mxu0 %vm354_vm1, %v291_v27 }
  0x36   : > { %2828 = vmatprep.mubr.msk.f32.mxu0 %vm3670_vm0, %v3671_v4  ;;  %2922 = vmatmul.mubr.msk.f32.gmra.mrb[18].mxu1 %vm354_vm1, %v323_v32 }
  0x37   : > { %2924 = vmatprep.mubr.msk.f32.mxu1 %vm3670_vm0, %v3671_v4 }
  0x39   : > { %2829 = vmatmul.mubr.msk.f32.gmra.mrb[20].mxu0 %vm354_vm1, %v292_v29 }
  0x3a   : > { %2831 = vmatprep.mubr.msk.f32.mxu0 %vm3670_vm0, %v3671_v4  ;;  %2925 = vmatmul.mubr.msk.f32.gmra.mrb[20].mxu1 %vm354_vm1, %v324_v34 }
  0x3b   : > { %2927 = vmatprep.mubr.msk.f32.mxu1 %vm3670_vm0, %v3671_v4 }
  0x3d   : > { %2832 = vmatmul.mubr.msk.f32.gmra.mrb[22].mxu0 %vm354_vm1, %v293_v31 }
  0x3e   : > { %2834 = vmatprep.mubr.msk.f32.mxu0 %vm3670_vm0, %v3671_v4  ;;  %2928 = vmatmul.mubr.msk.f32.gmra.mrb[22].mxu1 %vm354_vm1, %v325_v36 }
  0x3f   : > { %2930 = vmatprep.mubr.msk.f32.mxu1 %vm3670_vm0, %v3671_v4 }
  0x41   : > { %2835 = vmatmul.mubr.msk.f32.gmra.mrb[24].mxu0 %vm354_vm1, %v294_v33 }
  0x42   : > { %2837 = vmatprep.mubr.msk.f32.mxu0 %vm3670_vm0, %v3671_v4  ;;  %2931 = vmatmul.mubr.msk.f32.gmra.mrb[24].mxu1 %vm354_vm1, %v326_v38 }
  0x43   : > { %2933 = vmatprep.mubr.msk.f32.mxu1 %vm3670_vm0, %v3671_v4 }
  0x45   : > { %2838 = vmatmul.mubr.msk.f32.gmra.mrb[26].mxu0 %vm354_vm1, %v295_v35 }
  0x46   : > { %2840 = vmatprep.mubr.msk.f32.mxu0 %vm3670_vm0, %v3671_v4  ;;  %2934 = vmatmul.mubr.msk.f32.gmra.mrb[26].mxu1 %vm354_vm1, %v327_v40 }
  0x47   : > { %2936 = vmatprep.mubr.msk.f32.mxu1 %vm3670_vm0, %v3671_v4 }
  0x49   : > { %2841 = vmatmul.mubr.msk.f32.gmra.mrb[28].mxu0 %vm354_vm1, %v296_v37 }
  0x4a   : > { %2843 = vmatprep.mubr.msk.f32.mxu0 %vm3670_vm0, %v3671_v4  ;;  %2937 = vmatmul.mubr.msk.f32.gmra.mrb[28].mxu1 %vm354_vm1, %v328_v42 }
  0x4b   : > { %2939 = vmatprep.mubr.msk.f32.mxu1 %vm3670_vm0, %v3671_v4 }
  0x4d   : > { %2844 = vmatmul.mubr.msk.f32.gmra.mrb[30].mxu0 %vm354_vm1, %v297_v39 }
  0x4e   : > { %2846 = vmatprep.mubr.msk.f32.mxu0 %vm3670_vm0, %v3671_v4  ;;  %2940 = vmatmul.mubr.msk.f32.gmra.mrb[30].mxu1 %vm354_vm1, %v329_v44 }
  0x4f   : > { %2942 = vmatprep.mubr.msk.f32.mxu1 %vm3670_vm0, %v3671_v4 }
  0x51   : > { %2847 = vmatmul.mubr.msk.f32.gmra.mrb[32].mxu0 %vm354_vm1, %v298_v41 }
  0x52   : > { %2849 = vmatprep.mubr.msk.f32.mxu0 %vm3670_vm0, %v3671_v4  ;;  %2943 = vmatmul.mubr.msk.f32.gmra.mrb[32].mxu1 %vm354_vm1, %v330_v46 }
  0x53   : > { %2945 = vmatprep.mubr.msk.f32.mxu1 %vm3670_vm0, %v3671_v4 }
  0x55   : > { %2850 = vmatmul.mubr.msk.f32.gmra.mrb[34].mxu0 %vm354_vm1, %v299_v43 }
  0x56   : > { %2852 = vmatprep.mubr.msk.f32.mxu0 %vm3670_vm0, %v3671_v4  ;;  %2946 = vmatmul.mubr.msk.f32.gmra.mrb[34].mxu1 %vm354_vm1, %v331_v48 }
  0x57   : > { %2948 = vmatprep.mubr.msk.f32.mxu1 %vm3670_vm0, %v3671_v4 }
  0x59   : > { %2853 = vmatmul.mubr.msk.f32.gmra.mrb[36].mxu0 %vm354_vm1, %v300_v45 }
  0x5a   : > { %2855 = vmatprep.mubr.msk.f32.mxu0 %vm3670_vm0, %v3671_v4  ;;  %2949 = vmatmul.mubr.msk.f32.gmra.mrb[36].mxu1 %vm354_vm1, %v332_v50 }
  0x5b   : > { %2951 = vmatprep.mubr.msk.f32.mxu1 %vm3670_vm0, %v3671_v4 }
  0x5d   : > { %2856 = vmatmul.mubr.msk.f32.gmra.mrb[38].mxu0 %vm354_vm1, %v301_v47 }
  0x5e   : > { %2858 = vmatprep.mubr.msk.f32.mxu0 %vm3670_vm0, %v3671_v4  ;;  %2952 = vmatmul.mubr.msk.f32.gmra.mrb[38].mxu1 %vm354_vm1, %v333_v52 }
  0x5f   : > { %2954 = vmatprep.mubr.msk.f32.mxu1 %vm3670_vm0, %v3671_v4 }
  0x61   : > { %2859 = vmatmul.mubr.msk.f32.gmra.mrb[40].mxu0 %vm354_vm1, %v302_v49 }
  0x62   : > { %2861 = vmatprep.mubr.msk.f32.mxu0 %vm3670_vm0, %v3671_v4  ;;  %2955 = vmatmul.mubr.msk.f32.gmra.mrb[40].mxu1 %vm354_vm1, %v334_v54 }
  0x63   : > { %2957 = vmatprep.mubr.msk.f32.mxu1 %vm3670_vm0, %v3671_v4 }
  0x65   : > { %2862 = vmatmul.mubr.msk.f32.gmra.mrb[42].mxu0 %vm354_vm1, %v303_v51 }
  0x66   : > { %2864 = vmatprep.mubr.msk.f32.mxu0 %vm3670_vm0, %v3671_v4  ;;  %2958 = vmatmul.mubr.msk.f32.gmra.mrb[42].mxu1 %vm354_vm1, %v335_v56 }
  0x67   : > { %2960 = vmatprep.mubr.msk.f32.mxu1 %vm3670_vm0, %v3671_v4 }
  0x69   : > { %2865 = vmatmul.mubr.msk.f32.gmra.mrb[44].mxu0 %vm354_vm1, %v304_v53 }
  0x6a   : > { %2867 = vmatprep.mubr.msk.f32.mxu0 %vm3670_vm0, %v3671_v4  ;;  %2961 = vmatmul.mubr.msk.f32.gmra.mrb[44].mxu1 %vm354_vm1, %v336_v58 }
  0x6b   : > { %2963 = vmatprep.mubr.msk.f32.mxu1 %vm3670_vm0, %v3671_v4 }
  0x6d   : > { %2868 = vmatmul.mubr.msk.f32.gmra.mrb[46].mxu0 %vm354_vm1, %v305_v55 }
  0x6e   : > { %2870 = vmatprep.mubr.msk.f32.mxu0 %vm3670_vm0, %v3671_v4  ;;  %2964 = vmatmul.mubr.msk.f32.gmra.mrb[46].mxu1 %vm354_vm1, %v337_v60 }
  0x6f   : > { %2966 = vmatprep.mubr.msk.f32.mxu1 %vm3670_vm0, %v3671_v4 }
  0x71   : > { %2871 = vmatmul.mubr.msk.f32.gmra.mrb[48].mxu0 %vm354_vm1, %v306_v57 }
  0x72   : > { %2873 = vmatprep.mubr.msk.f32.mxu0 %vm3670_vm0, %v3671_v4  ;;  %2967 = vmatmul.mubr.msk.f32.gmra.mrb[48].mxu1 %vm354_vm1, %v338_v62 }
  0x73   : > { %2969 = vmatprep.mubr.msk.f32.mxu1 %vm3670_vm0, %v3671_v4 }
  0x75   : > { %2874 = vmatmul.mubr.msk.f32.gmra.mrb[50].mxu0 %vm354_vm1, %v307_v59 }
  0x76   : > { %2876 = vmatprep.mubr.msk.f32.mxu0 %vm3670_vm0, %v3671_v4  ;;  %2970 = vmatmul.mubr.msk.f32.gmra.mrb[50].mxu1 %vm354_vm1, %v339_v0 }
  0x77   : > { %2972 = vmatprep.mubr.msk.f32.mxu1 %vm3670_vm0, %v3671_v4 }
  0x79   : > { %2877 = vmatmul.mubr.msk.f32.gmra.mrb[52].mxu0 %vm354_vm1, %v308_v61 }
  0x7a   : > { %2879 = vmatprep.mubr.msk.f32.mxu0 %vm3670_vm0, %v3671_v4  ;;  %2973 = vmatmul.mubr.msk.f32.gmra.mrb[52].mxu1 %vm354_vm1, %v340_v3 }
  0x7b   : > { %2975 = vmatprep.mubr.msk.f32.mxu1 %vm3670_vm0, %v3671_v4 }
  0x7d   : > { %2880 = vmatmul.mubr.msk.f32.gmra.mrb[54].mxu0 %vm354_vm1, %v309_v63 }
  0x7e   : > { %2882 = vmatprep.mubr.msk.f32.mxu0 %vm3670_vm0, %v3671_v4  ;;  %2976 = vmatmul.mubr.msk.f32.gmra.mrb[54].mxu1 %vm354_vm1, %v341_v6 }
  0x7f   : > { %2978 = vmatprep.mubr.msk.f32.mxu1 %vm3670_vm0, %v3671_v4 }
  0x81   : > { %2883 = vmatmul.mubr.msk.f32.gmra.mrb[56].mxu0 %vm354_vm1, %v310_v1 }
  0x82   : > { %2885 = vmatprep.mubr.msk.f32.mxu0 %vm3670_vm0, %v3671_v4  ;;  %2979 = vmatmul.mubr.msk.f32.gmra.mrb[56].mxu1 %vm354_vm1, %v342_v8 }
  0x83   : > { %2981 = vmatprep.mubr.msk.f32.mxu1 %vm3670_vm0, %v3671_v4 }
  0x85   : > { %2886 = vmatmul.mubr.msk.f32.gmra.mrb[58].mxu0 %vm354_vm1, %v311_v5 }
  0x86   : > { %2888 = vmatprep.mubr.msk.f32.mxu0 %vm3670_vm0, %v3671_v4  ;;  %2982 = vmatmul.mubr.msk.f32.gmra.mrb[58].mxu1 %vm354_vm1, %v343_v10 }
  0x87   : > { %2984 = vmatprep.mubr.msk.f32.mxu1 %vm3670_vm0, %v3671_v4 }
  0x89   : > { %2889 = vmatmul.mubr.msk.f32.gmra.mrb[60].mxu0 %vm354_vm1, %v312_v7 }
  0x8a   : > { %2891 = vmatprep.mubr.msk.f32.mxu0 %vm3670_vm0, %v3671_v4  ;;  %2985 = vmatmul.mubr.msk.f32.gmra.mrb[60].mxu1 %vm354_vm1, %v344_v11 }
  0x8b   : > { %2995 = vmatprep.mubr.msk.f32.mxu1 %vm3670_vm0, %v3671_v4 }
  0x8d   : > { %2892 = vmatmul.mubr.msk.f32.gmra.mrb[62].mxu0 %vm354_vm1, %v313_v9 }
  0x8e   : > { %3192 = vmatprep.mubr.msk.f32.mxu0 %vm3670_vm0, %v3671_v4 }
  0xe4   : > { %v610_v16 = vpop.f32.mrb[0].mxu0 }
  0xe5   : > { %v611_v17 = vadd.f32 %v4019_v15, %v610_v16  ;;  %v2800_v18 = vpop.f32.mrb[1].mxu0  ;;  %v4023_v23 = vpop.f32.mrb[0].mxu1 }
  0xe6   : > { %v2896_v25 = vpop.f32.mrb[1].mxu1 }
  0xe7   : > { %3409 = vtanh.f32 %v611_v17 }
  0xe8   : > { %v615_v19 = vpop.f32.mrb[2].mxu0 }
  0xe9   : > { %v616_v20 = vadd.f32 %v4019_v15, %v615_v19  ;;  %v2803_v21 = vpop.f32.mrb[3].mxu0  ;;  %v4026_v27 = vpop.f32.mrb[2].mxu1  ;;  %v1633_v19 = vld [vmem:[%s4834_s5 + $0x10] sm:$0xff] }
  0xea   : > { %v2899_v31 = vpop.f32.mrb[3].mxu1 }
  0xeb   : > { %3411 = vtanh.f32 %v616_v20  ;;  %v1634_v20 = vld [vmem:[%s4834_s5 + $0x18] sm:$0xff] }
  0xec   : > { %v620_v22 = vpop.f32.mrb[4].mxu0  ;;  %v3394_v21 = vpack.c.bf16 %v1634_v20, %v1633_v19 }
  0xed   : > { %v621_v2 = vadd.f32 %v4019_v15, %v620_v22  ;;  %v2806_v24 = vpop.f32.mrb[5].mxu0  ;;  %v4032_v33 = vpop.f32.mrb[4].mxu1 }
  0xee   : > { %v2902_v37 = vpop.f32.mrb[5].mxu1  ;;  %3395 = vmatpush3.bf16.msra.mxu0 %v3394_v21 }
  0xef   : > { %3413 = vtanh.f32 %v621_v2 }
  0xf0   : > { %v625_v26 = vpop.f32.mrb[6].mxu0 }
  0xf1   : > { %v3410_v28 = vpop.eup %3409  ;;  %v626_v29 = vadd.f32 %v4019_v15, %v625_v26  ;;  %v2809_v30 = vpop.f32.mrb[7].mxu0 }
  0xf2   : > { %2996 = vmatmul.mubr.msk.f32.vlgmr.msra.gmra.mrb[62].mxu1 %vm998_vm2, %v3410_v28  ;;  %v4038_v39 = vpop.f32.mrb[6].mxu1 }
  0xf3   : > { %3415 = vtanh.f32 %v626_v29  ;;  %2998 = vmatprep.mubr.msk.f32.mxu1 %vm3670_vm0, %v3671_v4  ;;  %v2905_v43 = vpop.f32.mrb[7].mxu1 }
  0xf4   : > { %v630_v32 = vpop.f32.mrb[8].mxu0 }
  0xf5   : > { %v3412_v34 = vpop.eup %3411  ;;  %v631_v35 = vadd.f32 %v4019_v15, %v630_v32  ;;  %v2812_v36 = vpop.f32.mrb[9].mxu0 }
  0xf6   : > { %2999 = vmatmul.mubr.msk.f32.gmra.mrb[64].mxu1 %vm998_vm2, %v3412_v34  ;;  %v4044_v45 = vpop.f32.mrb[8].mxu1 }
  0xf7   : > { %3417 = vtanh.f32 %v631_v35  ;;  %3001 = vmatprep.mubr.msk.f32.mxu1 %vm3670_vm0, %v3671_v4  ;;  %v2908_v49 = vpop.f32.mrb[9].mxu1 }
  0xf8   : > { %v635_v38 = vpop.f32.mrb[10].mxu0 }
  0xf9   : > { %v3414_v40 = vpop.eup %3413  ;;  %v636_v41 = vadd.f32 %v4019_v15, %v635_v38  ;;  %v2815_v42 = vpop.f32.mrb[11].mxu0 }
  0xfa   : > { %3002 = vmatmul.mubr.msk.f32.gmra.mrb[66].mxu1 %vm998_vm2, %v3414_v40  ;;  %v4050_v51 = vpop.f32.mrb[10].mxu1 }
  0xfb   : > { %3419 = vtanh.f32 %v636_v41  ;;  %3004 = vmatprep.mubr.msk.f32.mxu1 %vm3670_vm0, %v3671_v4  ;;  %v2911_v55 = vpop.f32.mrb[11].mxu1 }
  0xfc   : > { %v640_v44 = vpop.f32.mrb[12].mxu0 }
  0xfd   : > { %v3416_v46 = vpop.eup %3415  ;;  %v641_v47 = vadd.f32 %v4019_v15, %v640_v44  ;;  %v2818_v48 = vpop.f32.mrb[13].mxu0 }
  0xfe   : > { %3005 = vmatmul.mubr.msk.f32.gmra.mrb[68].mxu1 %vm998_vm2, %v3416_v46  ;;  %v4056_v57 = vpop.f32.mrb[12].mxu1 }
  0xff   : > { %3421 = vtanh.f32 %v641_v47  ;;  %3007 = vmatprep.mubr.msk.f32.mxu1 %vm3670_vm0, %v3671_v4  ;;  %v2914_v61 = vpop.f32.mrb[13].mxu1 }
 0x100   : > { %v645_v50 = vpop.f32.mrb[14].mxu0 }
 0x101   : > { %v3418_v52 = vpop.eup %3417  ;;  %v646_v53 = vadd.f32 %v4019_v15, %v645_v50  ;;  %v2821_v54 = vpop.f32.mrb[15].mxu0 }
 0x102   : > { %3008 = vmatmul.mubr.msk.f32.gmra.mrb[70].mxu1 %vm998_vm2, %v3418_v52  ;;  %v4062_v63 = vpop.f32.mrb[14].mxu1 }
 0x103   : > { %3423 = vtanh.f32 %v646_v53  ;;  %3010 = vmatprep.mubr.msk.f32.mxu1 %vm3670_vm0, %v3671_v4  ;;  %v2917_v5 = vpop.f32.mrb[15].mxu1 }
 0x104   : > { %v650_v56 = vpop.f32.mrb[16].mxu0 }
 0x105   : > { %v3420_v58 = vpop.eup %3419  ;;  %v651_v59 = vadd.f32 %v4019_v15, %v650_v56  ;;  %v2824_v60 = vpop.f32.mrb[17].mxu0 }
 0x106   : > { %3011 = vmatmul.mubr.msk.f32.gmra.mrb[72].mxu1 %vm998_vm2, %v3420_v58  ;;  %v4068_v7 = vpop.f32.mrb[16].mxu1 }
 0x107   : > { %3425 = vtanh.f32 %v651_v59  ;;  %3013 = vmatprep.mubr.msk.f32.mxu1 %vm3670_vm0, %v3671_v4  ;;  %v2920_v11 = vpop.f32.mrb[17].mxu1 }
 0x108   : > { %v655_v62 = vpop.f32.mrb[18].mxu0 }
 0x109   : > { %v3422_v0 = vpop.eup %3421  ;;  %v656_v1 = vadd.f32 %v4019_v15, %v655_v62  ;;  %v2827_v3 = vpop.f32.mrb[19].mxu0 }
 0x10a   : > { %3014 = vmatmul.mubr.msk.f32.gmra.mrb[74].mxu1 %vm998_vm2, %v3422_v0  ;;  %v4074_v13 = vpop.f32.mrb[18].mxu1 }
 0x10b   : > { %3427 = vtanh.f32 %v656_v1  ;;  %3016 = vmatprep.mubr.msk.f32.mxu1 %vm3670_vm0, %v3671_v4  ;;  %v2923_v18 = vpop.f32.mrb[19].mxu1 }
 0x10c   : > { %v660_v6 = vpop.f32.mrb[20].mxu0 }
 0x10d   : > { %v3424_v8 = vpop.eup %3423  ;;  %v661_v9 = vadd.f32 %v4019_v15, %v660_v6  ;;  %v2830_v10 = vpop.f32.mrb[21].mxu0 }
 0x10e   : > { %3017 = vmatmul.mubr.msk.f32.gmra.mrb[76].mxu1 %vm998_vm2, %v3424_v8  ;;  %v4086_v2 = vpop.f32.mrb[20].mxu1 }
 0x10f   : > { %3429 = vtanh.f32 %v661_v9  ;;  %3019 = vmatprep.mubr.msk.f32.mxu1 %vm3670_vm0, %v3671_v4  ;;  %v2926_v28 = vpop.f32.mrb[21].mxu1 }
 0x110   : > { %v665_v12 = vpop.f32.mrb[22].mxu0 }
 0x111   : > { %v3426_v14 = vpop.eup %3425  ;;  %v666_v16 = vadd.f32 %v4019_v15, %v665_v12  ;;  %v2833_v17 = vpop.f32.mrb[23].mxu0 }
 0x112   : > { %3020 = vmatmul.mubr.msk.f32.gmra.mrb[78].mxu1 %vm998_vm2, %v3426_v14  ;;  %v4092_v30 = vpop.f32.mrb[22].mxu1 }
 0x113   : > { %3431 = vtanh.f32 %v666_v16  ;;  %3022 = vmatprep.mubr.msk.f32.mxu1 %vm3670_vm0, %v3671_v4  ;;  %v2929_v35 = vpop.f32.mrb[23].mxu1 }
 0x114   : > { %v670_v22 = vpop.f32.mrb[24].mxu0 }
 0x115   : > { %v3428_v24 = vpop.eup %3427  ;;  %v671_v25 = vadd.f32 %v4019_v15, %v670_v22  ;;  %v2836_v26 = vpop.f32.mrb[25].mxu0 }
 0x116   : > { %3023 = vmatmul.mubr.msk.f32.gmra.mrb[80].mxu1 %vm998_vm2, %v3428_v24  ;;  %v4098_v37 = vpop.f32.mrb[24].mxu1 }
 0x117   : > { %3433 = vtanh.f32 %v671_v25  ;;  %3025 = vmatprep.mubr.msk.f32.mxu1 %vm3670_vm0, %v3671_v4  ;;  %v2932_v42 = vpop.f32.mrb[25].mxu1 }
 0x118   : > { %v675_v29 = vpop.f32.mrb[26].mxu0 }
 0x119   : > { %v3430_v31 = vpop.eup %3429  ;;  %v676_v32 = vadd.f32 %v4019_v15, %v675_v29  ;;  %v2839_v34 = vpop.f32.mrb[27].mxu0 }
 0x11a   : > { %3026 = vmatmul.mubr.msk.f32.gmra.mrb[82].mxu1 %vm998_vm2, %v3430_v31  ;;  %v4104_v44 = vpop.f32.mrb[26].mxu1 }
 0x11b   : > { %3435 = vtanh.f32 %v676_v32  ;;  %3028 = vmatprep.mubr.msk.f32.mxu1 %vm3670_vm0, %v3671_v4  ;;  %v2935_v49 = vpop.f32.mrb[27].mxu1 }
 0x11c   : > { %v680_v36 = vpop.f32.mrb[28].mxu0 }
 0x11d   : > { %v3432_v38 = vpop.eup %3431  ;;  %v681_v40 = vadd.f32 %v4019_v15, %v680_v36  ;;  %v2842_v41 = vpop.f32.mrb[29].mxu0 }
 0x11e   : > { %3029 = vmatmul.mubr.msk.f32.gmra.mrb[84].mxu1 %vm998_vm2, %v3432_v38  ;;  %v4110_v52 = vpop.f32.mrb[28].mxu1 }
 0x11f   : > { %3437 = vtanh.f32 %v681_v40  ;;  %3031 = vmatprep.mubr.msk.f32.mxu1 %vm3670_vm0, %v3671_v4  ;;  %v2938_v56 = vpop.f32.mrb[29].mxu1 }
 0x120   : > { %v685_v43 = vpop.f32.mrb[30].mxu0 }
 0x121   : > { %v3434_v46 = vpop.eup %3433  ;;  %v686_v47 = vadd.f32 %v4019_v15, %v685_v43  ;;  %v2845_v48 = vpop.f32.mrb[31].mxu0 }
 0x122   : > { %3032 = vmatmul.mubr.msk.f32.gmra.mrb[86].mxu1 %vm998_vm2, %v3434_v46  ;;  %v4116_v59 = vpop.f32.mrb[30].mxu1 }
 0x123   : > { %3439 = vtanh.f32 %v686_v47  ;;  %3034 = vmatprep.mubr.msk.f32.mxu1 %vm3670_vm0, %v3671_v4  ;;  %v2941_v0 = vpop.f32.mrb[31].mxu1 }
 0x124   : > { %v690_v50 = vpop.f32.mrb[32].mxu0 }
 0x125   : > { %v3436_v53 = vpop.eup %3435  ;;  %v691_v54 = vadd.f32 %v4019_v15, %v690_v50  ;;  %v2848_v55 = vpop.f32.mrb[33].mxu0 }
 0x126   : > { %3035 = vmatmul.mubr.msk.f32.gmra.mrb[88].mxu1 %vm998_vm2, %v3436_v53  ;;  %v4122_v3 = vpop.f32.mrb[32].mxu1 }
 0x127   : > { %3441 = vtanh.f32 %v691_v54  ;;  %3037 = vmatprep.mubr.msk.f32.mxu1 %vm3670_vm0, %v3671_v4  ;;  %v2944_v9 = vpop.f32.mrb[33].mxu1 }
 0x128   : > { %v695_v58 = vpop.f32.mrb[34].mxu0 }
 0x129   : > { %v3438_v60 = vpop.eup %3437  ;;  %v696_v61 = vadd.f32 %v4019_v15, %v695_v58  ;;  %v2851_v62 = vpop.f32.mrb[35].mxu0 }
 0x12a   : > { %3038 = vmatmul.mubr.msk.f32.gmra.mrb[90].mxu1 %vm998_vm2, %v3438_v60  ;;  %v4128_v11 = vpop.f32.mrb[34].mxu1 }
 0x12b   : > { %3443 = vtanh.f32 %v696_v61  ;;  %3040 = vmatprep.mubr.msk.f32.mxu1 %vm3670_vm0, %v3671_v4  ;;  %v2947_v17 = vpop.f32.mrb[35].mxu1 }
 0x12c   : > { %v700_v1 = vpop.f32.mrb[36].mxu0 }
 0x12d   : > { %v3440_v5 = vpop.eup %3439  ;;  %v701_v6 = vadd.f32 %v4019_v15, %v700_v1  ;;  %v2854_v8 = vpop.f32.mrb[37].mxu0 }
 0x12e   : > { %3041 = vmatmul.mubr.msk.f32.gmra.mrb[92].mxu1 %vm998_vm2, %v3440_v5  ;;  %v4134_v19 = vpop.f32.mrb[36].mxu1 }
 0x12f   : > { %3445 = vtanh.f32 %v701_v6  ;;  %3043 = vmatprep.mubr.msk.f32.mxu1 %vm3670_vm0, %v3671_v4  ;;  %v2950_v24 = vpop.f32.mrb[37].mxu1 }
 0x130   : > { %v705_v10 = vpop.f32.mrb[38].mxu0 }
 0x131   : > { %v3442_v12 = vpop.eup %3441  ;;  %v706_v14 = vadd.f32 %v4019_v15, %v705_v10  ;;  %v2857_v16 = vpop.f32.mrb[39].mxu0 }
 0x132   : > { %3044 = vmatmul.mubr.msk.f32.gmra.mrb[94].mxu1 %vm998_vm2, %v3442_v12  ;;  %v4140_v26 = vpop.f32.mrb[38].mxu1 }
 0x133   : > { %3447 = vtanh.f32 %v706_v14  ;;  %3046 = vmatprep.mubr.msk.f32.mxu1 %vm3670_vm0, %v3671_v4  ;;  %v2953_v32 = vpop.f32.mrb[39].mxu1 }
 0x134   : > { %v710_v18 = vpop.f32.mrb[40].mxu0 }
 0x135   : > { %v3444_v20 = vpop.eup %3443  ;;  %v711_v21 = vadd.f32 %v4019_v15, %v710_v18  ;;  %v2860_v22 = vpop.f32.mrb[41].mxu0 }
 0x136   : > { %3047 = vmatmul.mubr.msk.f32.gmra.mrb[96].mxu1 %vm998_vm2, %v3444_v20  ;;  %v4146_v35 = vpop.f32.mrb[40].mxu1 }
 0x137   : > { %3449 = vtanh.f32 %v711_v21  ;;  %3049 = vmatprep.mubr.msk.f32.mxu1 %vm3670_vm0, %v3671_v4  ;;  %v2956_v41 = vpop.f32.mrb[41].mxu1 }
 0x138   : > { %v715_v25 = vpop.f32.mrb[42].mxu0 }
 0x139   : > { %v3446_v28 = vpop.eup %3445  ;;  %v716_v29 = vadd.f32 %v4019_v15, %v715_v25  ;;  %v2863_v31 = vpop.f32.mrb[43].mxu0 }
 0x13a   : > { %3050 = vmatmul.mubr.msk.f32.gmra.mrb[98].mxu1 %vm998_vm2, %v3446_v28  ;;  %v4152_v43 = vpop.f32.mrb[42].mxu1 }
 0x13b   : > { %3451 = vtanh.f32 %v716_v29  ;;  %3052 = vmatprep.mubr.msk.f32.mxu1 %vm3670_vm0, %v3671_v4  ;;  %v2959_v49 = vpop.f32.mrb[43].mxu1 }
 0x13c   : > { %v720_v34 = vpop.f32.mrb[44].mxu0 }
 0x13d   : > { %v3448_v36 = vpop.eup %3447  ;;  %v721_v38 = vadd.f32 %v4019_v15, %v720_v34  ;;  %v2866_v40 = vpop.f32.mrb[45].mxu0 }
 0x13e   : > { %3053 = vmatmul.mubr.msk.f32.gmra.mrb[100].mxu1 %vm998_vm2, %v3448_v36  ;;  %v4158_v53 = vpop.f32.mrb[44].mxu1 }
 0x13f   : > { %3453 = vtanh.f32 %v721_v38  ;;  %3055 = vmatprep.mubr.msk.f32.mxu1 %vm3670_vm0, %v3671_v4  ;;  %v2962_v58 = vpop.f32.mrb[45].mxu1 }
 0x140   : > { %v725_v42 = vpop.f32.mrb[46].mxu0 }
 0x141   : > { %v3450_v46 = vpop.eup %3449  ;;  %v726_v47 = vadd.f32 %v4019_v15, %v725_v42  ;;  %v2869_v48 = vpop.f32.mrb[47].mxu0 }
 0x142   : > { %3056 = vmatmul.mubr.msk.f32.gmra.mrb[102].mxu1 %vm998_vm2, %v3450_v46  ;;  %v4164_v61 = vpop.f32.mrb[46].mxu1 }
 0x143   : > { %3455 = vtanh.f32 %v726_v47  ;;  %3058 = vmatprep.mubr.msk.f32.mxu1 %vm3670_vm0, %v3671_v4  ;;  %v2965_v5 = vpop.f32.mrb[47].mxu1 }
 0x144   : > { %v730_v50 = vpop.f32.mrb[48].mxu0 }
 0x145   : > { %v3452_v54 = vpop.eup %3451  ;;  %v731_v55 = vadd.f32 %v4019_v15, %v730_v50  ;;  %v2872_v56 = vpop.f32.mrb[49].mxu0 }
 0x146   : > { %3059 = vmatmul.mubr.msk.f32.gmra.mrb[104].mxu1 %vm998_vm2, %v3452_v54  ;;  %v4170_v8 = vpop.f32.mrb[48].mxu1 }
 0x147   : > { %3457 = vtanh.f32 %v731_v55  ;;  %3061 = vmatprep.mubr.msk.f32.mxu1 %vm3670_vm0, %v3671_v4  ;;  %v2968_v14 = vpop.f32.mrb[49].mxu1 }
 0x148   : > { %v735_v60 = vpop.f32.mrb[50].mxu0 }
 0x149   : > { %v3454_v62 = vpop.eup %3453  ;;  %v736_v0 = vadd.f32 %v4019_v15, %v735_v60  ;;  %v2875_v1 = vpop.f32.mrb[51].mxu0 }
 0x14a   : > { %3062 = vmatmul.mubr.msk.f32.gmra.mrb[106].mxu1 %vm998_vm2, %v3454_v62  ;;  %v4176_v17 = vpop.f32.mrb[50].mxu1  ;;  %v771_v1 = vadd.f32 %v4019_v15, %v4023_v23  ;;  %v781_v23 = vadd.f32 %v4019_v15, %v4032_v33  ;;  %v791_v33 = vadd.f32 %v4019_v15, %v4044_v45  ;;  %v801_v45 = vadd.f32 %v4019_v15, %v4056_v57 }
 0x14b   : > { %3459 = vtanh.f32 %v736_v0  ;;  %3064 = vmatprep.mubr.msk.f32.mxu1 %vm3670_vm0, %v3671_v4  ;;  %v2971_v22 = vpop.f32.mrb[51].mxu1  ;;  %v811_v57 = vadd.f32 %v4019_v15, %v4068_v7  ;;  %v821_v7 = vadd.f32 %v4019_v15, %v4086_v2  ;;  %v831_v2 = vadd.f32 %v4019_v15, %v4098_v37 }
 0x14c   : > { %v740_v6 = vpop.f32.mrb[52].mxu0  ;;  %v841_v37 = vadd.f32 %v4019_v15, %v4110_v52  ;;  %v851_v52 = vadd.f32 %v4019_v15, %v4122_v3  ;;  %v861_v3 = vadd.f32 %v4019_v15, %v4134_v19  ;;  %v871_v19 = vadd.f32 %v4019_v15, %v4146_v35 }
 0x14d   : > { %v3456_v9 = vpop.eup %3455  ;;  %v741_v10 = vadd.f32 %v4019_v15, %v740_v6  ;;  %v2878_v12 = vpop.f32.mrb[53].mxu0  ;;  %v881_v35 = vadd.f32 %v4019_v15, %v4158_v53  ;;  %v891_v53 = vadd.f32 %v4019_v15, %v4170_v8 }
 0x14e   : > { %3065 = vmatmul.mubr.msk.f32.gmra.mrb[108].mxu1 %vm998_vm2, %v3456_v9  ;;  %v4182_v25 = vpop.f32.mrb[52].mxu1 }
 0x14f   : > { %3461 = vtanh.f32 %v741_v10  ;;  %3067 = vmatprep.mubr.msk.f32.mxu1 %vm3670_vm0, %v3671_v4  ;;  %v2974_v32 = vpop.f32.mrb[53].mxu1  ;;  %v776_v10 = vadd.f32 %v4019_v15, %v4026_v27  ;;  %v786_v27 = vadd.f32 %v4019_v15, %v4038_v39  ;;  %v796_v39 = vadd.f32 %v4019_v15, %v4050_v51 }
 0x150   : > { %v745_v16 = vpop.f32.mrb[54].mxu0  ;;  %v806_v51 = vadd.f32 %v4019_v15, %v4062_v63  ;;  %v816_v63 = vadd.f32 %v4019_v15, %v4074_v13  ;;  %v826_v13 = vadd.f32 %v4019_v15, %v4092_v30  ;;  %v836_v30 = vadd.f32 %v4019_v15, %v4104_v44 }
 0x151   : > { %v3458_v18 = vpop.eup %3457  ;;  %v746_v20 = vadd.f32 %v4019_v15, %v745_v16  ;;  %v2881_v21 = vpop.f32.mrb[55].mxu0  ;;  %v846_v44 = vadd.f32 %v4019_v15, %v4116_v59  ;;  %v856_v59 = vadd.f32 %v4019_v15, %v4128_v11  ;;  %v866_v11 = vadd.f32 %v4019_v15, %v4140_v26 }
 0x152   : > { %3068 = vmatmul.mubr.msk.f32.gmra.mrb[110].mxu1 %vm998_vm2, %v3458_v18  ;;  %v4188_v36 = vpop.f32.mrb[54].mxu1  ;;  %v876_v26 = vadd.f32 %v4019_v15, %v4152_v43  ;;  %v886_v43 = vadd.f32 %v4019_v15, %v4164_v61 }
 0x153   : > { %3463 = vtanh.f32 %v746_v20  ;;  %3070 = vmatprep.mubr.msk.f32.mxu1 %vm3670_vm0, %v3671_v4  ;;  %v2977_v42 = vpop.f32.mrb[55].mxu1 }
 0x154   : > { %v750_v24 = vpop.f32.mrb[56].mxu0 }
 0x155   : > { %v3460_v28 = vpop.eup %3459  ;;  %v751_v29 = vadd.f32 %v4019_v15, %v750_v24  ;;  %v2884_v31 = vpop.f32.mrb[57].mxu0 }
 0x156   : > { %3071 = vmatmul.mubr.msk.f32.gmra.mrb[112].mxu1 %vm998_vm2, %v3460_v28  ;;  %v4194_v47 = vpop.f32.mrb[56].mxu1 }
 0x157   : > { %3465 = vtanh.f32 %v751_v29  ;;  %3073 = vmatprep.mubr.msk.f32.mxu1 %vm3670_vm0, %v3671_v4  ;;  %v2980_v54 = vpop.f32.mrb[57].mxu1 }
 0x158   : > { %v755_v34 = vpop.f32.mrb[58].mxu0 }
 0x159   : > { %v3462_v38 = vpop.eup %3461  ;;  %v756_v40 = vadd.f32 %v4019_v15, %v755_v34  ;;  %v2887_v41 = vpop.f32.mrb[59].mxu0 }
 0x15a   : > { %3074 = vmatmul.mubr.msk.f32.gmra.mrb[114].mxu1 %vm998_vm2, %v3462_v38  ;;  %v4200_v56 = vpop.f32.mrb[58].mxu1 }
 0x15b   : > { %3467 = vtanh.f32 %v756_v40  ;;  %3076 = vmatprep.mubr.msk.f32.mxu1 %vm3670_vm0, %v3671_v4  ;;  %v2983_v0 = vpop.f32.mrb[59].mxu1 }
 0x15c   : > { %v760_v46 = vpop.f32.mrb[60].mxu0 }
 0x15d   : > { %v3464_v48 = vpop.eup %3463  ;;  %v761_v49 = vadd.f32 %v4019_v15, %v760_v46  ;;  %v2890_v50 = vpop.f32.mrb[61].mxu0 }
 0x15e   : > { %3077 = vmatmul.mubr.msk.f32.gmra.mrb[116].mxu1 %vm998_vm2, %v3464_v48  ;;  %v4208_v5 = vpop.f32.mrb[60].mxu1 }
 0x15f   : > { %3469 = vtanh.f32 %v761_v49  ;;  %3079 = vmatprep.mubr.msk.f32.mxu1 %vm3670_vm0, %v3671_v4  ;;  %v2986_v9 = vpop.f32.mrb[61].mxu1 }
 0x160   : > { %v765_v55 = vpop.f32.mrb[62].mxu0 }
 0x161   : > { %v3466_v58 = vpop.eup %3465  ;;  %v766_v60 = vadd.f32 %v4019_v15, %v765_v55  ;;  %v2893_v62 = vpop.f32.mrb[63].mxu0 }
 0x162   : > { %3080 = vmatmul.mubr.msk.f32.gmra.mrb[118].mxu1 %vm998_vm2, %v3466_v58  ;;  %v4331_v58 = vld [vmem:[%s4833_s4] ss:$0 sm:$0xff] }
 0x163   : > { %3471 = vtanh.f32 %v766_v60  ;;  %3082 = vmatprep.mubr.msk.f32.mxu1 %vm3670_vm0, %v3671_v4 }
 0x164   : > { %3473 = vtanh.f32 %v771_v1  ;;  %v896_v1 = vadd.f32 %v4019_v15, %v4176_v17 }
 0x165   : > { %v3468_v6 = vpop.eup %3467  ;;  %3475 = vtanh.f32 %v776_v10 }
 0x166   : > { %3083 = vmatmul.mubr.msk.f32.gmra.mrb[120].mxu1 %vm998_vm2, %v3468_v6  ;;  %3477 = vtanh.f32 %v781_v23 }
 0x167   : > { %3085 = vmatprep.mubr.msk.f32.mxu1 %vm3670_vm0, %v3671_v4  ;;  %3479 = vtanh.f32 %v786_v27 }
 0x168   : > { %3481 = vtanh.f32 %v791_v33 }
 0x169   : > { %v3470_v12 = vpop.eup %3469  ;;  %3483 = vtanh.f32 %v796_v39 }
 0x16a   : > { %3086 = vmatmul.mubr.msk.f32.gmra.mrb[122].mxu1 %vm998_vm2, %v3470_v12  ;;  %3485 = vtanh.f32 %v801_v45  ;;  %v901_v12 = vadd.f32 %v4019_v15, %v4182_v25  ;;  %v911_v45 = vadd.f32 %v4019_v15, %v4194_v47  ;;  %v916_v47 = vadd.f32 %v4019_v15, %v4200_v56 }
 0x16b   : > { %3088 = vmatprep.mubr.msk.f32.mxu1 %vm3670_vm0, %v3671_v4  ;;  %3487 = vtanh.f32 %v806_v51  ;;  %v921_v56 = vadd.f32 %v4019_v15, %v4208_v5 }
 0x16c   : > { %3489 = vtanh.f32 %v811_v57 }
 0x16d   : > { %v3472_v14 = vpop.eup %3471  ;;  %3491 = vtanh.f32 %v816_v63 }
 0x16e   : > { %3089 = vmatmul.mubr.msk.f32.gmra.mrb[124].mxu1 %vm998_vm2, %v3472_v14  ;;  %v3474_v16 = vpop.eup %3473  ;;  %3493 = vtanh.f32 %v821_v7 }
 0x16f   : > { %3091 = vmatprep.mubr.msk.f32.mxu1 %vm3670_vm0, %v3671_v4  ;;  %v3476_v18 = vpop.eup %3475  ;;  %3495 = vtanh.f32 %v826_v13 }
 0x170   : > { %v3478_v20 = vpop.eup %3477  ;;  %3497 = vtanh.f32 %v831_v2 }
 0x171   : > { %v3480_v21 = vpop.eup %3479  ;;  %3499 = vtanh.f32 %v836_v30 }
 0x172   : > { %3092 = vmatmul.mubr.msk.f32.gmra.mrb[126].mxu1 %vm998_vm2, %v3474_v16  ;;  %v3482_v22 = vpop.eup %3481  ;;  %3501 = vtanh.f32 %v841_v37  ;;  %v906_v16 = vadd.f32 %v4019_v15, %v4188_v36 }
 0x173   : > { %3094 = vmatprep.mubr.msk.f32.mxu1 %vm3670_vm0, %v3671_v4  ;;  %v3484_v24 = vpop.eup %3483  ;;  %3503 = vtanh.f32 %v846_v44 }
 0x174   : > { %v3486_v28 = vpop.eup %3485  ;;  %3505 = vtanh.f32 %v851_v52 }
 0x175   : > { %v3488_v29 = vpop.eup %3487  ;;  %3507 = vtanh.f32 %v856_v59 }
 0x176   : > { %3095 = vmatmul.mubr.msk.f32.gmra.mrb[128].mxu1 %vm998_vm2, %v3476_v18  ;;  %v3490_v31 = vpop.eup %3489  ;;  %3509 = vtanh.f32 %v861_v3 }
 0x177   : > { %3097 = vmatprep.mubr.msk.f32.mxu1 %vm3670_vm0, %v3671_v4  ;;  %v3492_v32 = vpop.eup %3491  ;;  %3511 = vtanh.f32 %v866_v11 }
 0x178   : > { %v3494_v34 = vpop.eup %3493  ;;  %3513 = vtanh.f32 %v871_v19 }
 0x179   : > { %v3496_v38 = vpop.eup %3495  ;;  %3515 = vtanh.f32 %v876_v26 }
 0x17a   : > { %3098 = vmatmul.mubr.msk.f32.gmra.mrb[130].mxu1 %vm998_vm2, %v3478_v20  ;;  %v3498_v40 = vpop.eup %3497  ;;  %3517 = vtanh.f32 %v881_v35 }
 0x17b   : > { %3100 = vmatprep.mubr.msk.f32.mxu1 %vm3670_vm0, %v3671_v4  ;;  %v3500_v41 = vpop.eup %3499  ;;  %3519 = vtanh.f32 %v886_v43 }
 0x17c   : > { %v3502_v42 = vpop.eup %3501  ;;  %3521 = vtanh.f32 %v891_v53 }
 0x17d   : > { %v3504_v46 = vpop.eup %3503 }
 0x17e   : > { %3101 = vmatmul.mubr.msk.f32.gmra.mrb[132].mxu1 %vm998_vm2, %v3480_v21  ;;  %v3506_v48 = vpop.eup %3505 }
 0x17f   : > { %3103 = vmatprep.mubr.msk.f32.mxu1 %vm3670_vm0, %v3671_v4  ;;  %v3508_v49 = vpop.eup %3507 }
 0x180   : > { %v3510_v50 = vpop.eup %3509 }
 0x181   : > { %v3512_v54 = vpop.eup %3511 }
 0x182   : > { %3104 = vmatmul.mubr.msk.f32.gmra.mrb[134].mxu1 %vm998_vm2, %v3482_v22  ;;  %v3514_v55 = vpop.eup %3513 }
 0x183   : > { %3106 = vmatprep.mubr.msk.f32.mxu1 %vm3670_vm0, %v3671_v4  ;;  %v3516_v60 = vpop.eup %3515 }
 0x184   : > { %v3518_v8 = vpop.eup %3517 }
 0x185   : > { %v3520_v17 = vpop.eup %3519 }
 0x186   : > { %3107 = vmatmul.mubr.msk.f32.gmra.mrb[136].mxu1 %vm998_vm2, %v3484_v24  ;;  %v3522_v25 = vpop.eup %3521 }
 0x187   : > { %3109 = vmatprep.mubr.msk.f32.mxu1 %vm3670_vm0, %v3671_v4 }
 0x18a   : > { %3110 = vmatmul.mubr.msk.f32.gmra.mrb[138].mxu1 %vm998_vm2, %v3486_v28 }
 0x18b   : > { %3112 = vmatprep.mubr.msk.f32.mxu1 %vm3670_vm0, %v3671_v4 }
 0x18e   : > { %3113 = vmatmul.mubr.msk.f32.gmra.mrb[140].mxu1 %vm998_vm2, %v3488_v29 }
 0x18f   : > { %3115 = vmatprep.mubr.msk.f32.mxu1 %vm3670_vm0, %v3671_v4 }
 0x192   : > { %3116 = vmatmul.mubr.msk.f32.gmra.mrb[142].mxu1 %vm998_vm2, %v3490_v31 }
 0x193   : > { %3118 = vmatprep.mubr.msk.f32.mxu1 %vm3670_vm0, %v3671_v4 }
 0x196   : > { %3119 = vmatmul.mubr.msk.f32.gmra.mrb[144].mxu1 %vm998_vm2, %v3492_v32 }
 0x197   : > { %3121 = vmatprep.mubr.msk.f32.mxu1 %vm3670_vm0, %v3671_v4 }
 0x19a   : > { %3122 = vmatmul.mubr.msk.f32.gmra.mrb[146].mxu1 %vm998_vm2, %v3494_v34 }
 0x19b   : > { %3124 = vmatprep.mubr.msk.f32.mxu1 %vm3670_vm0, %v3671_v4 }
 0x19e   : > { %3125 = vmatmul.mubr.msk.f32.gmra.mrb[148].mxu1 %vm998_vm2, %v3496_v38 }
 0x19f   : > { %3127 = vmatprep.mubr.msk.f32.mxu1 %vm3670_vm0, %v3671_v4 }
 0x1a2   : > { %3128 = vmatmul.mubr.msk.f32.gmra.mrb[150].mxu1 %vm998_vm2, %v3498_v40 }
 0x1a3   : > { %3130 = vmatprep.mubr.msk.f32.mxu1 %vm3670_vm0, %v3671_v4 }
 0x1a6   : > { %3131 = vmatmul.mubr.msk.f32.gmra.mrb[152].mxu1 %vm998_vm2, %v3500_v41 }
 0x1a7   : > { %3133 = vmatprep.mubr.msk.f32.mxu1 %vm3670_vm0, %v3671_v4 }
 0x1aa   : > { %3134 = vmatmul.mubr.msk.f32.gmra.mrb[154].mxu1 %vm998_vm2, %v3502_v42 }
 0x1ab   : > { %3136 = vmatprep.mubr.msk.f32.mxu1 %vm3670_vm0, %v3671_v4 }
 0x1ae   : > { %3137 = vmatmul.mubr.msk.f32.gmra.mrb[156].mxu1 %vm998_vm2, %v3504_v46 }
 0x1af   : > { %3139 = vmatprep.mubr.msk.f32.mxu1 %vm3670_vm0, %v3671_v4 }
 0x1b2   : > { %3140 = vmatmul.mubr.msk.f32.gmra.mrb[158].mxu1 %vm998_vm2, %v3506_v48 }
 0x1b3   : > { %3142 = vmatprep.mubr.msk.f32.mxu1 %vm3670_vm0, %v3671_v4 }
 0x1b6   : > { %3143 = vmatmul.mubr.msk.f32.gmra.mrb[160].mxu1 %vm998_vm2, %v3508_v49 }
 0x1b7   : > { %3145 = vmatprep.mubr.msk.f32.mxu1 %vm3670_vm0, %v3671_v4 }
 0x1ba   : > { %3146 = vmatmul.mubr.msk.f32.gmra.mrb[162].mxu1 %vm998_vm2, %v3510_v50 }
 0x1bb   : > { %3148 = vmatprep.mubr.msk.f32.mxu1 %vm3670_vm0, %v3671_v4 }
 0x1be   : > { %3149 = vmatmul.mubr.msk.f32.gmra.mrb[164].mxu1 %vm998_vm2, %v3512_v54 }
 0x1bf   : > { %3151 = vmatprep.mubr.msk.f32.mxu1 %vm3670_vm0, %v3671_v4 }
 0x1c2   : > { %3152 = vmatmul.mubr.msk.f32.gmra.mrb[166].mxu1 %vm998_vm2, %v3514_v55 }
 0x1c3   : > { %3154 = vmatprep.mubr.msk.f32.mxu1 %vm3670_vm0, %v3671_v4 }
 0x1c5   : > { %v1254_v61 = vpop.f32.mrb[62].mxu1 }
 0x1c6   : > { %v1255_v62 = vadd.f32 %v4331_v58, %v1254_v61  ;;  %v2997_v0 = vpop.f32.mrb[63].mxu1  ;;  %3155 = vmatmul.mubr.msk.f32.gmra.mrb[168].mxu1 %vm998_vm2, %v3516_v60 }
 0x1c7   : > { %3157 = vmatprep.mubr.msk.f32.mxu1 %vm3670_vm0, %v3671_v4 }
 0x1c8   : > { %3523 = vtanh.f32 %v1255_v62 }
 0x1c9   : > { %v1259_v6 = vpop.f32.mrb[64].mxu1  ;;  %3525 = vtanh.f32 %v896_v1 }
 0x1ca   : > { %v1260_v9 = vadd.f32 %v4331_v58, %v1259_v6  ;;  %v3000_v10 = vpop.f32.mrb[65].mxu1  ;;  %3158 = vmatmul.mubr.msk.f32.gmra.mrb[170].mxu1 %vm998_vm2, %v3518_v8 }
 0x1cb   : > { %3160 = vmatprep.mubr.msk.f32.mxu1 %vm3670_vm0, %v3671_v4 }
 0x1cc   : > { %3527 = vtanh.f32 %v1260_v9 }
 0x1cd   : > { %v1264_v23 = vpop.f32.mrb[66].mxu1  ;;  %3529 = vtanh.f32 %v901_v12 }
 0x1ce   : > { %v1265_v14 = vadd.f32 %v4331_v58, %v1264_v23  ;;  %v3003_v27 = vpop.f32.mrb[67].mxu1  ;;  %3161 = vmatmul.mubr.msk.f32.gmra.mrb[172].mxu1 %vm998_vm2, %v3520_v17 }
 0x1cf   : > { %3163 = vmatprep.mubr.msk.f32.mxu1 %vm3670_vm0, %v3671_v4 }
 0x1d0   : > { %3531 = vtanh.f32 %v1265_v14 }
 0x1d1   : > { %v1269_v33 = vpop.f32.mrb[68].mxu1  ;;  %3533 = vtanh.f32 %v906_v16 }
 0x1d2   : > { %v3524_v18 = vpop.eup %3523  ;;  %v1270_v39 = vadd.f32 %v4331_v58, %v1269_v33  ;;  %v3006_v20 = vpop.f32.mrb[69].mxu1  ;;  %3164 = vmatmul.mubr.msk.f32.gmra.mrb[174].mxu1 %vm998_vm2, %v3522_v25 }
 0x1d3   : > { %3193 = vmatmul.mubr.msk.f32.vlgmr.msra.gmra.mrb[64].mxu0 %vm998_vm2, %v3524_v18  ;;  %3166 = vmatprep.mubr.msk.f32.mxu1 %vm3670_vm0, %v3671_v4  ;;  %v3526_v36 = vpop.eup %3525 }
 0x1d4   : > { %3535 = vtanh.f32 %v1270_v39  ;;  %3195 = vmatprep.mubr.msk.f32.mxu0 %vm3670_vm0, %v3671_v4 }
 0x1d5   : > { %v1274_v21 = vpop.f32.mrb[70].mxu1  ;;  %3537 = vtanh.f32 %v911_v45 }
 0x1d6   : > { %v3528_v51 = vpop.eup %3527  ;;  %v1275_v22 = vadd.f32 %v4331_v58, %v1274_v21  ;;  %v3009_v57 = vpop.f32.mrb[71].mxu1  ;;  %3167 = vmatmul.mubr.msk.f32.gmra.mrb[176].mxu1 %vm998_vm2, %v3526_v36 }
 0x1d7   : > { %3196 = vmatmul.mubr.msk.f32.gmra.mrb[66].mxu0 %vm998_vm2, %v3528_v51  ;;  %3169 = vmatprep.mubr.msk.f32.mxu1 %vm3670_vm0, %v3671_v4  ;;  %v3530_v24 = vpop.eup %3529 }
 0x1d8   : > { %3539 = vtanh.f32 %v1275_v22  ;;  %3198 = vmatprep.mubr.msk.f32.mxu0 %vm3670_vm0, %v3671_v4 }
 0x1d9   : > { %v1279_v63 = vpop.f32.mrb[72].mxu1  ;;  %3541 = vtanh.f32 %v916_v47 }
 0x1da   : > { %v3532_v28 = vpop.eup %3531  ;;  %v1280_v7 = vadd.f32 %v4331_v58, %v1279_v63  ;;  %v3012_v29 = vpop.f32.mrb[73].mxu1  ;;  %3170 = vmatmul.mubr.msk.f32.gmra.mrb[178].mxu1 %vm998_vm2, %v3530_v24 }
 0x1db   : > { %3199 = vmatmul.mubr.msk.f32.gmra.mrb[68].mxu0 %vm998_vm2, %v3532_v28  ;;  %3172 = vmatprep.mubr.msk.f32.mxu1 %vm3670_vm0, %v3671_v4  ;;  %v3534_v13 = vpop.eup %3533 }
 0x1dc   : > { %3543 = vtanh.f32 %v1280_v7  ;;  %3201 = vmatprep.mubr.msk.f32.mxu0 %vm3670_vm0, %v3671_v4 }
 0x1dd   : > { %v1284_v31 = vpop.f32.mrb[74].mxu1  ;;  %3545 = vtanh.f32 %v921_v56 }
 0x1de   : > { %v3536_v2 = vpop.eup %3535  ;;  %v1285_v32 = vadd.f32 %v4331_v58, %v1284_v31  ;;  %v3015_v30 = vpop.f32.mrb[75].mxu1  ;;  %3173 = vmatmul.mubr.msk.f32.gmra.mrb[180].mxu1 %vm998_vm2, %v3534_v13 }
 0x1df   : > { %3202 = vmatmul.mubr.msk.f32.gmra.mrb[70].mxu0 %vm998_vm2, %v3536_v2  ;;  %3175 = vmatprep.mubr.msk.f32.mxu1 %vm3670_vm0, %v3671_v4  ;;  %v3538_v15 = vpop.eup %3537 }
 0x1e0   : > { %3547 = vtanh.f32 %v1285_v32  ;;  %3204 = vmatprep.mubr.msk.f32.mxu0 %vm3670_vm0, %v3671_v4 }
 0x1e1   : > { %v1289_v5 = vpop.f32.mrb[76].mxu1 }
 0x1e2   : > { %v3540_v34 = vpop.eup %3539  ;;  %v1290_v37 = vadd.f32 %v4331_v58, %v1289_v5  ;;  %v3018_v38 = vpop.f32.mrb[77].mxu1  ;;  %3176 = vmatmul.mubr.msk.f32.gmra.mrb[182].mxu1 %vm998_vm2, %v3538_v15 }
 0x1e3   : > { %3205 = vmatmul.mubr.msk.f32.gmra.mrb[72].mxu0 %vm998_vm2, %v3540_v34  ;;  %3178 = vmatprep.mubr.msk.f32.mxu1 %vm3670_vm0, %v3671_v4  ;;  %v3542_v44 = vpop.eup %3541 }
 0x1e4   : > { %3549 = vtanh.f32 %v1290_v37  ;;  %3207 = vmatprep.mubr.msk.f32.mxu0 %vm3670_vm0, %v3671_v4 }
 0x1e5   : > { %v1294_v40 = vpop.f32.mrb[78].mxu1 }
 0x1e6   : > { %v3544_v52 = vpop.eup %3543  ;;  %v1295_v41 = vadd.f32 %v4331_v58, %v1294_v40  ;;  %v3021_v59 = vpop.f32.mrb[79].mxu1  ;;  %3179 = vmatmul.mubr.msk.f32.gmra.mrb[184].mxu1 %vm998_vm2, %v3542_v44 }
 0x1e7   : > { %3208 = vmatmul.mubr.msk.f32.gmra.mrb[74].mxu0 %vm998_vm2, %v3544_v52  ;;  %3181 = vmatprep.mubr.msk.f32.mxu1 %vm3670_vm0, %v3671_v4  ;;  %v3546_v42 = vpop.eup %3545 }
 0x1e8   : > { %3551 = vtanh.f32 %v1295_v41  ;;  %3210 = vmatprep.mubr.msk.f32.mxu0 %vm3670_vm0, %v3671_v4 }
 0x1e9   : > { %v1299_v3 = vpop.f32.mrb[80].mxu1 }
 0x1ea   : > { %v3548_v46 = vpop.eup %3547  ;;  %v1300_v11 = vadd.f32 %v4331_v58, %v1299_v3  ;;  %v3024_v48 = vpop.f32.mrb[81].mxu1  ;;  %3182 = vmatmul.mubr.msk.f32.gmra.mrb[186].mxu1 %vm998_vm2, %v3546_v42 }
 0x1eb   : > { %3211 = vmatmul.mubr.msk.f32.gmra.mrb[76].mxu0 %vm998_vm2, %v3548_v46 }
 0x1ec   : > { %3553 = vtanh.f32 %v1300_v11  ;;  %3213 = vmatprep.mubr.msk.f32.mxu0 %vm3670_vm0, %v3671_v4 }
 0x1ed   : > { %v1304_v19 = vpop.f32.mrb[82].mxu1 }
 0x1ee   : > { %v3550_v49 = vpop.eup %3549  ;;  %v1305_v26 = vadd.f32 %v4331_v58, %v1304_v19  ;;  %v3027_v50 = vpop.f32.mrb[83].mxu1 }
 0x1ef   : > { %3214 = vmatmul.mubr.msk.f32.gmra.mrb[78].mxu0 %vm998_vm2, %v3550_v49 }
 0x1f0   : > { %3555 = vtanh.f32 %v1305_v26  ;;  %3216 = vmatprep.mubr.msk.f32.mxu0 %vm3670_vm0, %v3671_v4 }
 0x1f1   : > { %v1309_v35 = vpop.f32.mrb[84].mxu1 }
 0x1f2   : > { %v3552_v54 = vpop.eup %3551  ;;  %v1310_v43 = vadd.f32 %v4331_v58, %v1309_v35  ;;  %v3030_v55 = vpop.f32.mrb[85].mxu1 }
 0x1f3   : > { %3217 = vmatmul.mubr.msk.f32.gmra.mrb[80].mxu0 %vm998_vm2, %v3552_v54 }
 0x1f4   : > { %3557 = vtanh.f32 %v1310_v43  ;;  %3219 = vmatprep.mubr.msk.f32.mxu0 %vm3670_vm0, %v3671_v4 }
 0x1f5   : > { %v1314_v53 = vpop.f32.mrb[86].mxu1 }
 0x1f6   : > { %v3554_v60 = vpop.eup %3553  ;;  %v1315_v61 = vadd.f32 %v4331_v58, %v1314_v53  ;;  %v3033_v62 = vpop.f32.mrb[87].mxu1 }
 0x1f7   : > { %3220 = vmatmul.mubr.msk.f32.gmra.mrb[82].mxu0 %vm998_vm2, %v3554_v60 }
 0x1f8   : > { %3559 = vtanh.f32 %v1315_v61  ;;  %3222 = vmatprep.mubr.msk.f32.mxu0 %vm3670_vm0, %v3671_v4 }
 0x1f9   : > { %v1319_v0 = vpop.f32.mrb[88].mxu1 }
 0x1fa   : > { %v3556_v1 = vpop.eup %3555  ;;  %v1320_v8 = vadd.f32 %v4331_v58, %v1319_v0  ;;  %v3036_v6 = vpop.f32.mrb[89].mxu1 }
 0x1fb   : > { %3223 = vmatmul.mubr.msk.f32.gmra.mrb[84].mxu0 %vm998_vm2, %v3556_v1 }
 0x1fc   : > { %3561 = vtanh.f32 %v1320_v8  ;;  %3225 = vmatprep.mubr.msk.f32.mxu0 %vm3670_vm0, %v3671_v4 }
 0x1fd   : > { %v1324_v9 = vpop.f32.mrb[90].mxu1 }
 0x1fe   : > { %v3558_v10 = vpop.eup %3557  ;;  %v1325_v12 = vadd.f32 %v4331_v58, %v1324_v9  ;;  %v3039_v17 = vpop.f32.mrb[91].mxu1 }
 0x1ff   : > { %3226 = vmatmul.mubr.msk.f32.gmra.mrb[86].mxu0 %vm998_vm2, %v3558_v10 }
 0x200   : > { %3563 = vtanh.f32 %v1325_v12  ;;  %3228 = vmatprep.mubr.msk.f32.mxu0 %vm3670_vm0, %v3671_v4 }
 0x201   : > { %v1329_v23 = vpop.f32.mrb[92].mxu1 }
 0x202   : > { %v3560_v14 = vpop.eup %3559  ;;  %v1330_v27 = vadd.f32 %v4331_v58, %v1329_v23  ;;  %v3042_v16 = vpop.f32.mrb[93].mxu1 }
 0x203   : > { %3229 = vmatmul.mubr.msk.f32.gmra.mrb[88].mxu0 %vm998_vm2, %v3560_v14 }
 0x204   : > { %3565 = vtanh.f32 %v1330_v27  ;;  %3231 = vmatprep.mubr.msk.f32.mxu0 %vm3670_vm0, %v3671_v4 }
 0x205   : > { %v1334_v25 = vpop.f32.mrb[94].mxu1 }
 0x206   : > { %v3562_v33 = vpop.eup %3561  ;;  %v1335_v18 = vadd.f32 %v4331_v58, %v1334_v25  ;;  %v3045_v39 = vpop.f32.mrb[95].mxu1 }
 0x207   : > { %3232 = vmatmul.mubr.msk.f32.gmra.mrb[90].mxu0 %vm998_vm2, %v3562_v33 }
 0x208   : > { %3567 = vtanh.f32 %v1335_v18  ;;  %3234 = vmatprep.mubr.msk.f32.mxu0 %vm3670_vm0, %v3671_v4 }
 0x209   : > { %v1339_v20 = vpop.f32.mrb[96].mxu1 }
 0x20a   : > { %v3564_v45 = vpop.eup %3563  ;;  %v1340_v36 = vadd.f32 %v4331_v58, %v1339_v20  ;;  %v3048_v21 = vpop.f32.mrb[97].mxu1 }
 0x20b   : > { %3235 = vmatmul.mubr.msk.f32.gmra.mrb[92].mxu0 %vm998_vm2, %v3564_v45 }
 0x20c   : > { %3569 = vtanh.f32 %v1340_v36  ;;  %3237 = vmatprep.mubr.msk.f32.mxu0 %vm3670_vm0, %v3671_v4 }
 0x20d   : > { %v1344_v51 = vpop.f32.mrb[98].mxu1 }
 0x20e   : > { %v3566_v22 = vpop.eup %3565  ;;  %v1345_v57 = vadd.f32 %v4331_v58, %v1344_v51  ;;  %v3051_v47 = vpop.f32.mrb[99].mxu1 }
 0x20f   : > { %3238 = vmatmul.mubr.msk.f32.gmra.mrb[94].mxu0 %vm998_vm2, %v3566_v22 }
 0x210   : > { %3571 = vtanh.f32 %v1345_v57  ;;  %3240 = vmatprep.mubr.msk.f32.mxu0 %vm3670_vm0, %v3671_v4 }
 0x211   : > { %v1349_v24 = vpop.f32.mrb[100].mxu1 }
 0x212   : > { %v3568_v63 = vpop.eup %3567  ;;  %v1350_v28 = vadd.f32 %v4331_v58, %v1349_v24  ;;  %v3054_v7 = vpop.f32.mrb[101].mxu1 }
 0x213   : > { %3241 = vmatmul.mubr.msk.f32.gmra.mrb[96].mxu0 %vm998_vm2, %v3568_v63 }
 0x214   : > { %3573 = vtanh.f32 %v1350_v28  ;;  %3243 = vmatprep.mubr.msk.f32.mxu0 %vm3670_vm0, %v3671_v4 }
 0x215   : > { %v1354_v29 = vpop.f32.mrb[102].mxu1 }
 0x216   : > { %v3570_v56 = vpop.eup %3569  ;;  %v1355_v13 = vadd.f32 %v4331_v58, %v1354_v29  ;;  %v3057_v31 = vpop.f32.mrb[103].mxu1 }
 0x217   : > { %3244 = vmatmul.mubr.msk.f32.gmra.mrb[98].mxu0 %vm998_vm2, %v3570_v56 }
 0x218   : > { %3575 = vtanh.f32 %v1355_v13  ;;  %3246 = vmatprep.mubr.msk.f32.mxu0 %vm3670_vm0, %v3671_v4 }
 0x219   : > { %v1359_v2 = vpop.f32.mrb[104].mxu1 }
 0x21a   : > { %v3572_v32 = vpop.eup %3571  ;;  %v1360_v30 = vadd.f32 %v4331_v58, %v1359_v2  ;;  %v3060_v15 = vpop.f32.mrb[105].mxu1 }
 0x21b   : > { %3247 = vmatmul.mubr.msk.f32.gmra.mrb[100].mxu0 %vm998_vm2, %v3572_v32 }
 0x21c   : > { %3577 = vtanh.f32 %v1360_v30  ;;  %3249 = vmatprep.mubr.msk.f32.mxu0 %vm3670_vm0, %v3671_v4 }
 0x21d   : > { %v1364_v5 = vpop.f32.mrb[106].mxu1 }
 0x21e   : > { %v3574_v34 = vpop.eup %3573  ;;  %v1365_v37 = vadd.f32 %v4331_v58, %v1364_v5  ;;  %v3063_v38 = vpop.f32.mrb[107].mxu1 }
 0x21f   : > { %3250 = vmatmul.mubr.msk.f32.gmra.mrb[102].mxu0 %vm998_vm2, %v3574_v34 }
 0x220   : > { %3579 = vtanh.f32 %v1365_v37  ;;  %3252 = vmatprep.mubr.msk.f32.mxu0 %vm3670_vm0, %v3671_v4 }
 0x221   : > { %v1369_v44 = vpop.f32.mrb[108].mxu1 }
 0x222   : > { %v3576_v40 = vpop.eup %3575  ;;  %v1370_v52 = vadd.f32 %v4331_v58, %v1369_v44  ;;  %v3066_v41 = vpop.f32.mrb[109].mxu1 }
 0x223   : > { %3253 = vmatmul.mubr.msk.f32.gmra.mrb[104].mxu0 %vm998_vm2, %v3576_v40 }
 0x224   : > { %3581 = vtanh.f32 %v1370_v52  ;;  %3255 = vmatprep.mubr.msk.f32.mxu0 %vm3670_vm0, %v3671_v4 }
 0x225   : > { %v1374_v59 = vpop.f32.mrb[110].mxu1 }
 0x226   : > { %v3578_v42 = vpop.eup %3577  ;;  %v1375_v3 = vadd.f32 %v4331_v58, %v1374_v59  ;;  %v3069_v46 = vpop.f32.mrb[111].mxu1 }
 0x227   : > { %3256 = vmatmul.mubr.msk.f32.gmra.mrb[106].mxu0 %vm998_vm2, %v3578_v42 }
 0x228   : > { %3583 = vtanh.f32 %v1375_v3  ;;  %3258 = vmatprep.mubr.msk.f32.mxu0 %vm3670_vm0, %v3671_v4 }
 0x229   : > { %v1379_v11 = vpop.f32.mrb[112].mxu1 }
 0x22a   : > { %v3580_v48 = vpop.eup %3579  ;;  %v1380_v19 = vadd.f32 %v4331_v58, %v1379_v11  ;;  %v3072_v49 = vpop.f32.mrb[113].mxu1 }
 0x22b   : > { %3259 = vmatmul.mubr.msk.f32.gmra.mrb[108].mxu0 %vm998_vm2, %v3580_v48 }
 0x22c   : > { %3585 = vtanh.f32 %v1380_v19  ;;  %3261 = vmatprep.mubr.msk.f32.mxu0 %vm3670_vm0, %v3671_v4 }
 0x22d   : > { %v1384_v26 = vpop.f32.mrb[114].mxu1 }
 0x22e   : > { %v3582_v50 = vpop.eup %3581  ;;  %v1385_v35 = vadd.f32 %v4331_v58, %v1384_v26  ;;  %v3075_v54 = vpop.f32.mrb[115].mxu1 }
 0x22f   : > { %3262 = vmatmul.mubr.msk.f32.gmra.mrb[110].mxu0 %vm998_vm2, %v3582_v50 }
 0x230   : > { %3587 = vtanh.f32 %v1385_v35  ;;  %3264 = vmatprep.mubr.msk.f32.mxu0 %vm3670_vm0, %v3671_v4 }
 0x231   : > { %v1389_v43 = vpop.f32.mrb[116].mxu1 }
 0x232   : > { %v3584_v55 = vpop.eup %3583  ;;  %v1390_v53 = vadd.f32 %v4331_v58, %v1389_v43  ;;  %v3078_v60 = vpop.f32.mrb[117].mxu1 }
 0x233   : > { %3265 = vmatmul.mubr.msk.f32.gmra.mrb[112].mxu0 %vm998_vm2, %v3584_v55 }
 0x234   : > { %3589 = vtanh.f32 %v1390_v53  ;;  %3267 = vmatprep.mubr.msk.f32.mxu0 %vm3670_vm0, %v3671_v4 }
 0x235   : > { %v1394_v61 = vpop.f32.mrb[118].mxu1 }
 0x236   : > { %v3586_v62 = vpop.eup %3585  ;;  %v1395_v0 = vadd.f32 %v4331_v58, %v1394_v61  ;;  %v3081_v1 = vpop.f32.mrb[119].mxu1 }
 0x237   : > { %3268 = vmatmul.mubr.msk.f32.gmra.mrb[114].mxu0 %vm998_vm2, %v3586_v62 }
 0x238   : > { %3591 = vtanh.f32 %v1395_v0  ;;  %3270 = vmatprep.mubr.msk.f32.mxu0 %vm3670_vm0, %v3671_v4 }
 0x239   : > { %v1399_v8 = vpop.f32.mrb[120].mxu1 }
 0x23a   : > { %v3588_v6 = vpop.eup %3587  ;;  %v1400_v9 = vadd.f32 %v4331_v58, %v1399_v8  ;;  %v3084_v10 = vpop.f32.mrb[121].mxu1 }
 0x23b   : > { %3271 = vmatmul.mubr.msk.f32.gmra.mrb[116].mxu0 %vm998_vm2, %v3588_v6 }
 0x23c   : > { %3593 = vtanh.f32 %v1400_v9  ;;  %3273 = vmatprep.mubr.msk.f32.mxu0 %vm3670_vm0, %v3671_v4 }
 0x23d   : > { %v1404_v12 = vpop.f32.mrb[122].mxu1 }
 0x23e   : > { %v3590_v17 = vpop.eup %3589  ;;  %v1405_v23 = vadd.f32 %v4331_v58, %v1404_v12  ;;  %v3087_v14 = vpop.f32.mrb[123].mxu1 }
 0x23f   : > { %3274 = vmatmul.mubr.msk.f32.gmra.mrb[118].mxu0 %vm998_vm2, %v3590_v17 }
 0x240   : > { %3595 = vtanh.f32 %v1405_v23  ;;  %3276 = vmatprep.mubr.msk.f32.mxu0 %vm3670_vm0, %v3671_v4 }
 0x241   : > { %v1409_v27 = vpop.f32.mrb[124].mxu1 }
 0x242   : > { %v3592_v16 = vpop.eup %3591  ;;  %v1410_v25 = vadd.f32 %v4331_v58, %v1409_v27  ;;  %v3090_v33 = vpop.f32.mrb[125].mxu1 }
 0x243   : > { %3277 = vmatmul.mubr.msk.f32.gmra.mrb[120].mxu0 %vm998_vm2, %v3592_v16 }
 0x244   : > { %3597 = vtanh.f32 %v1410_v25  ;;  %3279 = vmatprep.mubr.msk.f32.mxu0 %vm3670_vm0, %v3671_v4 }
 0x245   : > { %v1414_v18 = vpop.f32.mrb[126].mxu1 }
 0x246   : > { %v3594_v39 = vpop.eup %3593  ;;  %v1415_v20 = vadd.f32 %v4331_v58, %v1414_v18  ;;  %v3093_v45 = vpop.f32.mrb[127].mxu1 }
 0x247   : > { %3280 = vmatmul.mubr.msk.f32.gmra.mrb[122].mxu0 %vm998_vm2, %v3594_v39 }
 0x248   : > { %3599 = vtanh.f32 %v1415_v20  ;;  %3282 = vmatprep.mubr.msk.f32.mxu0 %vm3670_vm0, %v3671_v4 }
 0x249   : > { %v1419_v36 = vpop.f32.mrb[128].mxu1 }
 0x24a   : > { %v3596_v21 = vpop.eup %3595  ;;  %v1420_v51 = vadd.f32 %v4331_v58, %v1419_v36  ;;  %v3096_v22 = vpop.f32.mrb[129].mxu1 }
 0x24b   : > { %3283 = vmatmul.mubr.msk.f32.gmra.mrb[124].mxu0 %vm998_vm2, %v3596_v21 }
 0x24c   : > { %3601 = vtanh.f32 %v1420_v51  ;;  %3285 = vmatprep.mubr.msk.f32.mxu0 %vm3670_vm0, %v3671_v4 }
 0x24d   : > { %v1424_v57 = vpop.f32.mrb[130].mxu1 }
 0x24e   : > { %v3598_v47 = vpop.eup %3597  ;;  %v1425_v24 = vadd.f32 %v4331_v58, %v1424_v57  ;;  %v3099_v63 = vpop.f32.mrb[131].mxu1 }
 0x24f   : > { %3286 = vmatmul.mubr.msk.f32.gmra.mrb[126].mxu0 %vm998_vm2, %v3598_v47 }
 0x250   : > { %3603 = vtanh.f32 %v1425_v24  ;;  %3288 = vmatprep.mubr.msk.f32.mxu0 %vm3670_vm0, %v3671_v4 }
 0x251   : > { %v1429_v28 = vpop.f32.mrb[132].mxu1 }
 0x252   : > { %v3600_v7 = vpop.eup %3599  ;;  %v1430_v29 = vadd.f32 %v4331_v58, %v1429_v28  ;;  %v3102_v56 = vpop.f32.mrb[133].mxu1 }
 0x253   : > { %3289 = vmatmul.mubr.msk.f32.gmra.mrb[128].mxu0 %vm998_vm2, %v3600_v7 }
 0x254   : > { %3605 = vtanh.f32 %v1430_v29  ;;  %3291 = vmatprep.mubr.msk.f32.mxu0 %vm3670_vm0, %v3671_v4 }
 0x255   : > { %v1434_v13 = vpop.f32.mrb[134].mxu1 }
 0x256   : > { %v3602_v31 = vpop.eup %3601  ;;  %v1435_v2 = vadd.f32 %v4331_v58, %v1434_v13  ;;  %v3105_v32 = vpop.f32.mrb[135].mxu1 }
 0x257   : > { %3292 = vmatmul.mubr.msk.f32.gmra.mrb[130].mxu0 %vm998_vm2, %v3602_v31 }
 0x258   : > { %3607 = vtanh.f32 %v1435_v2  ;;  %3294 = vmatprep.mubr.msk.f32.mxu0 %vm3670_vm0, %v3671_v4 }
 0x259   : > { %v1439_v30 = vpop.f32.mrb[136].mxu1 }
 0x25a   : > { %v3604_v15 = vpop.eup %3603  ;;  %v1440_v5 = vadd.f32 %v4331_v58, %v1439_v30  ;;  %v3108_v34 = vpop.f32.mrb[137].mxu1 }
 0x25b   : > { %3295 = vmatmul.mubr.msk.f32.gmra.mrb[132].mxu0 %vm998_vm2, %v3604_v15 }
 0x25c   : > { %3609 = vtanh.f32 %v1440_v5  ;;  %3297 = vmatprep.mubr.msk.f32.mxu0 %vm3670_vm0, %v3671_v4 }
 0x25d   : > { %v1444_v37 = vpop.f32.mrb[138].mxu1 }
 0x25e   : > { %v3606_v38 = vpop.eup %3605  ;;  %v1445_v44 = vadd.f32 %v4331_v58, %v1444_v37  ;;  %v3111_v40 = vpop.f32.mrb[139].mxu1 }
 0x25f   : > { %3298 = vmatmul.mubr.msk.f32.gmra.mrb[134].mxu0 %vm998_vm2, %v3606_v38 }
 0x260   : > { %3611 = vtanh.f32 %v1445_v44  ;;  %3300 = vmatprep.mubr.msk.f32.mxu0 %vm3670_vm0, %v3671_v4 }
 0x261   : > { %v1449_v52 = vpop.f32.mrb[140].mxu1 }
 0x262   : > { %v3608_v41 = vpop.eup %3607  ;;  %v1450_v59 = vadd.f32 %v4331_v58, %v1449_v52  ;;  %v3114_v42 = vpop.f32.mrb[141].mxu1 }
 0x263   : > { %3301 = vmatmul.mubr.msk.f32.gmra.mrb[136].mxu0 %vm998_vm2, %v3608_v41 }
 0x264   : > { %3613 = vtanh.f32 %v1450_v59  ;;  %3303 = vmatprep.mubr.msk.f32.mxu0 %vm3670_vm0, %v3671_v4 }
 0x265   : > { %v1454_v3 = vpop.f32.mrb[142].mxu1 }
 0x266   : > { %v3610_v46 = vpop.eup %3609  ;;  %v1455_v11 = vadd.f32 %v4331_v58, %v1454_v3  ;;  %v3117_v48 = vpop.f32.mrb[143].mxu1 }
 0x267   : > { %3304 = vmatmul.mubr.msk.f32.gmra.mrb[138].mxu0 %vm998_vm2, %v3610_v46 }
 0x268   : > { %3615 = vtanh.f32 %v1455_v11  ;;  %3306 = vmatprep.mubr.msk.f32.mxu0 %vm3670_vm0, %v3671_v4  ;;  %v4591_v11 = vld [vmem:[%s4835_s6] ss:$0 sm:$0xff] }
 0x269   : > { %v1459_v19 = vpop.f32.mrb[144].mxu1 }
 0x26a   : > { %v3612_v49 = vpop.eup %3611  ;;  %v1460_v26 = vadd.f32 %v4331_v58, %v1459_v19  ;;  %v3120_v50 = vpop.f32.mrb[145].mxu1 }
 0x26b   : > { %3307 = vmatmul.mubr.msk.f32.gmra.mrb[140].mxu0 %vm998_vm2, %v3612_v49 }
 0x26c   : > { %3617 = vtanh.f32 %v1460_v26  ;;  %3309 = vmatprep.mubr.msk.f32.mxu0 %vm3670_vm0, %v3671_v4 }
 0x26d   : > { %v1464_v35 = vpop.f32.mrb[146].mxu1 }
 0x26e   : > { %v3614_v54 = vpop.eup %3613  ;;  %v1465_v43 = vadd.f32 %v4331_v58, %v1464_v35  ;;  %v3123_v55 = vpop.f32.mrb[147].mxu1 }
 0x26f   : > { %3310 = vmatmul.mubr.msk.f32.gmra.mrb[142].mxu0 %vm998_vm2, %v3614_v54 }
 0x270   : > { %3619 = vtanh.f32 %v1465_v43  ;;  %3312 = vmatprep.mubr.msk.f32.mxu0 %vm3670_vm0, %v3671_v4 }
 0x271   : > { %v1469_v53 = vpop.f32.mrb[148].mxu1 }
 0x272   : > { %v3616_v60 = vpop.eup %3615  ;;  %v1470_v61 = vadd.f32 %v4331_v58, %v1469_v53  ;;  %v3126_v62 = vpop.f32.mrb[149].mxu1 }
 0x273   : > { %3313 = vmatmul.mubr.msk.f32.gmra.mrb[144].mxu0 %vm998_vm2, %v3616_v60 }
 0x274   : > { %3621 = vtanh.f32 %v1470_v61  ;;  %3315 = vmatprep.mubr.msk.f32.mxu0 %vm3670_vm0, %v3671_v4 }
 0x275   : > { %v1474_v0 = vpop.f32.mrb[150].mxu1 }
 0x276   : > { %v3618_v1 = vpop.eup %3617  ;;  %v1475_v8 = vadd.f32 %v4331_v58, %v1474_v0  ;;  %v3129_v6 = vpop.f32.mrb[151].mxu1 }
 0x277   : > { %3316 = vmatmul.mubr.msk.f32.gmra.mrb[146].mxu0 %vm998_vm2, %v3618_v1 }
 0x278   : > { %3623 = vtanh.f32 %v1475_v8  ;;  %3318 = vmatprep.mubr.msk.f32.mxu0 %vm3670_vm0, %v3671_v4 }
 0x279   : > { %v1479_v9 = vpop.f32.mrb[152].mxu1 }
 0x27a   : > { %v3620_v10 = vpop.eup %3619  ;;  %v1480_v12 = vadd.f32 %v4331_v58, %v1479_v9  ;;  %v3132_v17 = vpop.f32.mrb[153].mxu1 }
 0x27b   : > { %3319 = vmatmul.mubr.msk.f32.gmra.mrb[148].mxu0 %vm998_vm2, %v3620_v10 }
 0x27c   : > { %3625 = vtanh.f32 %v1480_v12  ;;  %3321 = vmatprep.mubr.msk.f32.mxu0 %vm3670_vm0, %v3671_v4 }
 0x27d   : > { %v1484_v23 = vpop.f32.mrb[154].mxu1 }
 0x27e   : > { %v3622_v14 = vpop.eup %3621  ;;  %v1485_v27 = vadd.f32 %v4331_v58, %v1484_v23  ;;  %v3135_v16 = vpop.f32.mrb[155].mxu1 }
 0x27f   : > { %3322 = vmatmul.mubr.msk.f32.gmra.mrb[150].mxu0 %vm998_vm2, %v3622_v14 }
 0x280   : > { %3627 = vtanh.f32 %v1485_v27  ;;  %3324 = vmatprep.mubr.msk.f32.mxu0 %vm3670_vm0, %v3671_v4 }
 0x281   : > { %v1489_v25 = vpop.f32.mrb[156].mxu1 }
 0x282   : > { %v3624_v33 = vpop.eup %3623  ;;  %v1490_v18 = vadd.f32 %v4331_v58, %v1489_v25  ;;  %v3138_v39 = vpop.f32.mrb[157].mxu1 }
 0x283   : > { %3325 = vmatmul.mubr.msk.f32.gmra.mrb[152].mxu0 %vm998_vm2, %v3624_v33 }
 0x284   : > { %3629 = vtanh.f32 %v1490_v18  ;;  %3327 = vmatprep.mubr.msk.f32.mxu0 %vm3670_vm0, %v3671_v4 }
 0x285   : > { %v1494_v20 = vpop.f32.mrb[158].mxu1 }
 0x286   : > { %v3626_v45 = vpop.eup %3625  ;;  %v1495_v36 = vadd.f32 %v4331_v58, %v1494_v20  ;;  %v3141_v21 = vpop.f32.mrb[159].mxu1 }
 0x287   : > { %3328 = vmatmul.mubr.msk.f32.gmra.mrb[154].mxu0 %vm998_vm2, %v3626_v45 }
 0x288   : > { %3631 = vtanh.f32 %v1495_v36  ;;  %3330 = vmatprep.mubr.msk.f32.mxu0 %vm3670_vm0, %v3671_v4 }
 0x289   : > { %v1499_v51 = vpop.f32.mrb[160].mxu1 }
 0x28a   : > { %v3628_v22 = vpop.eup %3627  ;;  %v1500_v57 = vadd.f32 %v4331_v58, %v1499_v51  ;;  %v3144_v47 = vpop.f32.mrb[161].mxu1 }
 0x28b   : > { %3331 = vmatmul.mubr.msk.f32.gmra.mrb[156].mxu0 %vm998_vm2, %v3628_v22 }
 0x28c   : > { %3633 = vtanh.f32 %v1500_v57  ;;  %3333 = vmatprep.mubr.msk.f32.mxu0 %vm3670_vm0, %v3671_v4 }
 0x28d   : > { %v1504_v24 = vpop.f32.mrb[162].mxu1 }
 0x28e   : > { %v3630_v63 = vpop.eup %3629  ;;  %v1505_v28 = vadd.f32 %v4331_v58, %v1504_v24  ;;  %v3147_v7 = vpop.f32.mrb[163].mxu1 }
 0x28f   : > { %3334 = vmatmul.mubr.msk.f32.gmra.mrb[158].mxu0 %vm998_vm2, %v3630_v63 }
 0x290   : > { %3635 = vtanh.f32 %v1505_v28  ;;  %3336 = vmatprep.mubr.msk.f32.mxu0 %vm3670_vm0, %v3671_v4 }
 0x291   : > { %v1509_v29 = vpop.f32.mrb[164].mxu1 }
 0x292   : > { %v3632_v56 = vpop.eup %3631  ;;  %v1510_v13 = vadd.f32 %v4331_v58, %v1509_v29  ;;  %v3150_v31 = vpop.f32.mrb[165].mxu1 }
 0x293   : > { %3337 = vmatmul.mubr.msk.f32.gmra.mrb[160].mxu0 %vm998_vm2, %v3632_v56 }
 0x294   : > { %3637 = vtanh.f32 %v1510_v13  ;;  %3339 = vmatprep.mubr.msk.f32.mxu0 %vm3670_vm0, %v3671_v4 }
 0x295   : > { %v1514_v2 = vpop.f32.mrb[166].mxu1 }
 0x296   : > { %v3634_v32 = vpop.eup %3633  ;;  %v1515_v30 = vadd.f32 %v4331_v58, %v1514_v2  ;;  %v3153_v15 = vpop.f32.mrb[167].mxu1 }
 0x297   : > { %3340 = vmatmul.mubr.msk.f32.gmra.mrb[162].mxu0 %vm998_vm2, %v3634_v32 }
 0x298   : > { %3639 = vtanh.f32 %v1515_v30  ;;  %3342 = vmatprep.mubr.msk.f32.mxu0 %vm3670_vm0, %v3671_v4 }
 0x299   : > { %v1519_v5 = vpop.f32.mrb[168].mxu1 }
 0x29a   : > { %v3636_v34 = vpop.eup %3635  ;;  %v1520_v37 = vadd.f32 %v4331_v58, %v1519_v5  ;;  %v3156_v38 = vpop.f32.mrb[169].mxu1 }
 0x29b   : > { %3343 = vmatmul.mubr.msk.f32.gmra.mrb[164].mxu0 %vm998_vm2, %v3636_v34 }
 0x29c   : > { %3641 = vtanh.f32 %v1520_v37  ;;  %3345 = vmatprep.mubr.msk.f32.mxu0 %vm3670_vm0, %v3671_v4 }
 0x29d   : > { %v1524_v44 = vpop.f32.mrb[170].mxu1 }
 0x29e   : > { %v3638_v40 = vpop.eup %3637  ;;  %v1525_v52 = vadd.f32 %v4331_v58, %v1524_v44  ;;  %v3159_v41 = vpop.f32.mrb[171].mxu1 }
 0x29f   : > { %3346 = vmatmul.mubr.msk.f32.gmra.mrb[166].mxu0 %vm998_vm2, %v3638_v40 }
 0x2a0   : > { %3643 = vtanh.f32 %v1525_v52  ;;  %3348 = vmatprep.mubr.msk.f32.mxu0 %vm3670_vm0, %v3671_v4 }
 0x2a1   : > { %v1529_v59 = vpop.f32.mrb[172].mxu1 }
 0x2a2   : > { %v3640_v42 = vpop.eup %3639  ;;  %v1530_v3 = vadd.f32 %v4331_v58, %v1529_v59  ;;  %v3162_v46 = vpop.f32.mrb[173].mxu1 }
 0x2a3   : > { %3349 = vmatmul.mubr.msk.f32.gmra.mrb[168].mxu0 %vm998_vm2, %v3640_v42 }
 0x2a4   : > { %3645 = vtanh.f32 %v1530_v3  ;;  %3351 = vmatprep.mubr.msk.f32.mxu0 %vm3670_vm0, %v3671_v4 }
 0x2a5   : > { %v1534_v48 = vpop.f32.mrb[174].mxu1 }
 0x2a6   : > { %v3642_v19 = vpop.eup %3641  ;;  %v1535_v49 = vadd.f32 %v4331_v58, %v1534_v48  ;;  %v3165_v26 = vpop.f32.mrb[175].mxu1 }
 0x2a7   : > { %v1897_v50 = vpop.f32.mrb[64].mxu0  ;;  %3352 = vmatmul.mubr.msk.f32.gmra.mrb[170].mxu0 %vm998_vm2, %v3642_v19 }
 0x2a8   : > { %v1898_v35 = vadd.f32 %v4591_v11, %v1897_v50  ;;  %v3194_v54 = vpop.f32.mrb[65].mxu0  ;;  %3647 = vtanh.f32 %v1535_v49  ;;  %3354 = vmatprep.mubr.msk.f32.mxu0 %vm3670_vm0, %v3671_v4 }
 0x2a9   : > { %v1539_v55 = vpop.f32.mrb[176].mxu1 }
 0x2aa   : > { %v2211_v43 = vmax.f32 %v1898_v35, 0.0  ;;  %v3644_v53 = vpop.eup %3643  ;;  %v1540_v60 = vadd.f32 %v4331_v58, %v1539_v55  ;;  %v3168_v61 = vpop.f32.mrb[177].mxu1 }
 0x2ab   : > { %v1902_v62 = vpop.f32.mrb[66].mxu0  ;;  %3355 = vmatmul.mubr.msk.f32.gmra.mrb[172].mxu0 %vm998_vm2, %v3644_v53 }
 0x2ac   : > { %2275 = vst.msk [vmem:[%s4603_s16] sm:$0xff] %vm2274_vm3, %v2211_v43  ;;  %v1903_v0 = vadd.f32 %v4591_v11, %v1902_v62  ;;  %v3197_v1 = vpop.f32.mrb[67].mxu0  ;;  %3649 = vtanh.f32 %v1540_v60  ;;  %3357 = vmatprep.mubr.msk.f32.mxu0 %vm3670_vm0, %v3671_v4 }
 0x2ad   : > { %v1544_v6 = vpop.f32.mrb[178].mxu1 }
 0x2ae   : > { %v2212_v8 = vmax.f32 %v1903_v0, 0.0  ;;  %v3646_v9 = vpop.eup %3645  ;;  %v1545_v10 = vadd.f32 %v4331_v58, %v1544_v6  ;;  %v3171_v12 = vpop.f32.mrb[179].mxu1 }
 0x2af   : > { %v1907_v17 = vpop.f32.mrb[68].mxu0  ;;  %3358 = vmatmul.mubr.msk.f32.gmra.mrb[174].mxu0 %vm998_vm2, %v3646_v9 }
 0x2b0   : > { %2276 = vst.msk [vmem:[%s4603_s16 + $0x8] sm:$0xff] %vm2274_vm3, %v2212_v8  ;;  %v1908_v23 = vadd.f32 %v4591_v11, %v1907_v17  ;;  %v3200_v14 = vpop.f32.mrb[69].mxu0  ;;  %3651 = vtanh.f32 %v1545_v10  ;;  %3360 = vmatprep.mubr.msk.f32.mxu0 %vm3670_vm0, %v3671_v4 }
 0x2b1   : > { %v1549_v16 = vpop.f32.mrb[180].mxu1 }
 0x2b2   : > { %v2213_v27 = vmax.f32 %v1908_v23, 0.0  ;;  %v3648_v25 = vpop.eup %3647  ;;  %v1550_v33 = vadd.f32 %v4331_v58, %v1549_v16  ;;  %v3174_v18 = vpop.f32.mrb[181].mxu1 }
 0x2b3   : > { %v1912_v39 = vpop.f32.mrb[70].mxu0  ;;  %3361 = vmatmul.mubr.msk.f32.gmra.mrb[176].mxu0 %vm998_vm2, %v3648_v25 }
 0x2b4   : > { %2277 = vst.msk [vmem:[%s4603_s16 + $0x10] sm:$0xff] %vm2274_vm3, %v2213_v27  ;;  %v1913_v20 = vadd.f32 %v4591_v11, %v1912_v39  ;;  %v3203_v45 = vpop.f32.mrb[71].mxu0  ;;  %3653 = vtanh.f32 %v1550_v33  ;;  %3363 = vmatprep.mubr.msk.f32.mxu0 %vm3670_vm0, %v3671_v4 }
 0x2b5   : > { %v1554_v21 = vpop.f32.mrb[182].mxu1 }
 0x2b6   : > { %v2214_v36 = vmax.f32 %v1913_v20, 0.0  ;;  %v3650_v51 = vpop.eup %3649  ;;  %v1555_v22 = vadd.f32 %v4331_v58, %v1554_v21  ;;  %v3177_v57 = vpop.f32.mrb[183].mxu1 }
 0x2b7   : > { %v1917_v47 = vpop.f32.mrb[72].mxu0  ;;  %3364 = vmatmul.mubr.msk.f32.gmra.mrb[178].mxu0 %vm998_vm2, %v3650_v51 }
 0x2b8   : > { %2278 = vst.msk [vmem:[%s4603_s16 + $0x18] sm:$0xff] %vm2274_vm3, %v2214_v36  ;;  %v1918_v24 = vadd.f32 %v4591_v11, %v1917_v47  ;;  %v3206_v63 = vpop.f32.mrb[73].mxu0  ;;  %3655 = vtanh.f32 %v1555_v22  ;;  %3366 = vmatprep.mubr.msk.f32.mxu0 %vm3670_vm0, %v3671_v4 }
 0x2b9   : > { %v1559_v7 = vpop.f32.mrb[184].mxu1 }
 0x2ba   : > { %v2215_v28 = vmax.f32 %v1918_v24, 0.0  ;;  %v3652_v29 = vpop.eup %3651  ;;  %v1560_v56 = vadd.f32 %v4331_v58, %v1559_v7  ;;  %v3180_v13 = vpop.f32.mrb[185].mxu1 }
 0x2bb   : > { %v1922_v31 = vpop.f32.mrb[74].mxu0  ;;  %3367 = vmatmul.mubr.msk.f32.gmra.mrb[180].mxu0 %vm998_vm2, %v3652_v29 }
 0x2bc   : > { %2279 = vst.msk [vmem:[%s4603_s16 + $0x20] sm:$0xff] %vm2274_vm3, %v2215_v28  ;;  %v1923_v2 = vadd.f32 %v4591_v11, %v1922_v31  ;;  %v3209_v32 = vpop.f32.mrb[75].mxu0  ;;  %3657 = vtanh.f32 %v1560_v56  ;;  %3369 = vmatprep.mubr.msk.f32.mxu0 %vm3670_vm0, %v3671_v4 }
 0x2bd   : > { %v1564_v15 = vpop.f32.mrb[186].mxu1 }
 0x2be   : > { %v2216_v30 = vmax.f32 %v1923_v2, 0.0  ;;  %v3654_v5 = vpop.eup %3653  ;;  %v1565_v34 = vadd.f32 %v4331_v58, %v1564_v15  ;;  %v3183_v37 = vpop.f32.mrb[187].mxu1 }
 0x2bf   : > { %v1927_v38 = vpop.f32.mrb[76].mxu0  ;;  %3370 = vmatmul.mubr.msk.f32.gmra.mrb[182].mxu0 %vm998_vm2, %v3654_v5 }
 0x2c0   : > { %2280 = vst.msk [vmem:[%s4603_s16 + $0x28] sm:$0xff] %vm2274_vm3, %v2216_v30  ;;  %v1928_v44 = vadd.f32 %v4591_v11, %v1927_v38  ;;  %v3212_v40 = vpop.f32.mrb[77].mxu0  ;;  %3659 = vtanh.f32 %v1565_v34  ;;  %3372 = vmatprep.mubr.msk.f32.mxu0 %vm3670_vm0, %v3671_v4 }
 0x2c2   : > { %v2217_v52 = vmax.f32 %v1928_v44, 0.0  ;;  %v3656_v41 = vpop.eup %3655  ;;  %v1932_v59 = vpop.f32.mrb[78].mxu0 }
 0x2c3   : > { %v1933_v58 = vadd.f32 %v4591_v11, %v1932_v59  ;;  %v3215_v42 = vpop.f32.mrb[79].mxu0  ;;  %3373 = vmatmul.mubr.msk.f32.gmra.mrb[184].mxu0 %vm998_vm2, %v3656_v41 }
 0x2c4   : > { %2281 = vst.msk [vmem:[%s4603_s16 + $0x30] sm:$0xff] %vm2274_vm3, %v2217_v52  ;;  %3375 = vmatprep.mubr.msk.f32.mxu0 %vm3670_vm0, %v3671_v4 }
 0x2c5   : > { %v2218_v3 = vmax.f32 %v1933_v58, 0.0 }
 0x2c6   : > { %v3658_v46 = vpop.eup %3657  ;;  %v1937_v48 = vpop.f32.mrb[80].mxu0 }
 0x2c7   : > { %2282 = vst.msk [vmem:[%s4603_s16 + $0x38] sm:$0xff] %vm2274_vm3, %v2218_v3  ;;  %v1938_v19 = vadd.f32 %v4591_v11, %v1937_v48  ;;  %v3218_v49 = vpop.f32.mrb[81].mxu0  ;;  %3376 = vmatmul.mubr.msk.f32.gmra.mrb[186].mxu0 %vm998_vm2, %v3658_v46 }
 0x2c8   : > { %3378 = vmatprep.mubr.msk.f32.mxu0 %vm3670_vm0, %v3671_v4 }
 0x2c9   : > { %v2219_v26 = vmax.f32 %v1938_v19, 0.0 }
 0x2ca   : > { %v3660_v50 = vpop.eup %3659  ;;  %v1942_v35 = vpop.f32.mrb[82].mxu0 }
 0x2cb   : > { %2283 = vst.msk [vmem:[%s4603_s16 + $0x40] sm:$0xff] %vm2274_vm3, %v2219_v26  ;;  %v1943_v54 = vadd.f32 %v4591_v11, %v1942_v35  ;;  %v3221_v43 = vpop.f32.mrb[83].mxu0  ;;  %3379 = vmatmul.mubr.msk.f32.gmra.mrb[188].mxu0 %vm998_vm2, %v3660_v50 }
 0x2cd   : > { %v2220_v55 = vmax.f32 %v1943_v54, 0.0 }
 0x2ce   : > { %v1947_v53 = vpop.f32.mrb[84].mxu0 }
 0x2cf   : > { %2284 = vst.msk [vmem:[%s4603_s16 + $0x48] sm:$0xff] %vm2274_vm3, %v2220_v55  ;;  %v1948_v60 = vadd.f32 %v4591_v11, %v1947_v53  ;;  %v3224_v61 = vpop.f32.mrb[85].mxu0 }
 0x2d1   : > { %v2221_v4 = vmax.f32 %v1948_v60, 0.0 }
 0x2d2   : > { %v1952_v62 = vpop.f32.mrb[86].mxu0 }
 0x2d3   : > { %2285 = vst.msk [vmem:[%s4603_s16 + $0x50] sm:$0xff] %vm2274_vm3, %v2221_v4  ;;  %v1953_v0 = vadd.f32 %v4591_v11, %v1952_v62  ;;  %v3227_v1 = vpop.f32.mrb[87].mxu0 }
 0x2d5   : > { %v2222_v8 = vmax.f32 %v1953_v0, 0.0 }
 0x2d6   : > { %v1957_v6 = vpop.f32.mrb[88].mxu0 }
 0x2d7   : > { %2286 = vst.msk [vmem:[%s4603_s16 + $0x58] sm:$0xff] %vm2274_vm3, %v2222_v8  ;;  %v1958_v9 = vadd.f32 %v4591_v11, %v1957_v6  ;;  %v3230_v10 = vpop.f32.mrb[89].mxu0 }
 0x2d9   : > { %v2223_v12 = vmax.f32 %v1958_v9, 0.0 }
 0x2da   : > { %v1962_v17 = vpop.f32.mrb[90].mxu0 }
 0x2db   : > { %2287 = vst.msk [vmem:[%s4603_s16 + $0x60] sm:$0xff] %vm2274_vm3, %v2223_v12  ;;  %v1963_v23 = vadd.f32 %v4591_v11, %v1962_v17  ;;  %v3233_v14 = vpop.f32.mrb[91].mxu0 }
 0x2dd   : > { %v2224_v27 = vmax.f32 %v1963_v23, 0.0 }
 0x2de   : > { %v1967_v16 = vpop.f32.mrb[92].mxu0 }
 0x2df   : > { %2288 = vst.msk [vmem:[%s4603_s16 + $0x68] sm:$0xff] %vm2274_vm3, %v2224_v27  ;;  %v1968_v25 = vadd.f32 %v4591_v11, %v1967_v16  ;;  %v3236_v33 = vpop.f32.mrb[93].mxu0 }
 0x2e1   : > { %v2225_v18 = vmax.f32 %v1968_v25, 0.0 }
 0x2e2   : > { %v1972_v39 = vpop.f32.mrb[94].mxu0 }
 0x2e3   : > { %2289 = vst.msk [vmem:[%s4603_s16 + $0x70] sm:$0xff] %vm2274_vm3, %v2225_v18  ;;  %v1973_v20 = vadd.f32 %v4591_v11, %v1972_v39  ;;  %v3239_v45 = vpop.f32.mrb[95].mxu0 }
 0x2e5   : > { %v2226_v36 = vmax.f32 %v1973_v20, 0.0 }
 0x2e6   : > { %v1977_v21 = vpop.f32.mrb[96].mxu0 }
 0x2e7   : > { %2290 = vst.msk [vmem:[%s4603_s16 + $0x78] sm:$0xff] %vm2274_vm3, %v2226_v36  ;;  %v1978_v51 = vadd.f32 %v4591_v11, %v1977_v21  ;;  %v3242_v22 = vpop.f32.mrb[97].mxu0 }
 0x2e9   : > { %v2227_v57 = vmax.f32 %v1978_v51, 0.0 }
 0x2ea   : > { %v1982_v47 = vpop.f32.mrb[98].mxu0 }
 0x2eb   : > { %2291 = vst.msk [vmem:[%s4603_s16 + $0x80] sm:$0xff] %vm2274_vm3, %v2227_v57  ;;  %v1983_v24 = vadd.f32 %v4591_v11, %v1982_v47  ;;  %v3245_v63 = vpop.f32.mrb[99].mxu0 }
 0x2ed   : > { %v2228_v28 = vmax.f32 %v1983_v24, 0.0 }
 0x2ee   : > { %v1987_v7 = vpop.f32.mrb[100].mxu0 }
 0x2ef   : > { %2292 = vst.msk [vmem:[%s4603_s16 + $0x88] sm:$0xff] %vm2274_vm3, %v2228_v28  ;;  %v1988_v29 = vadd.f32 %v4591_v11, %v1987_v7  ;;  %v3248_v56 = vpop.f32.mrb[101].mxu0 }
 0x2f1   : > { %v2229_v13 = vmax.f32 %v1988_v29, 0.0 }
 0x2f2   : > { %v1992_v31 = vpop.f32.mrb[102].mxu0 }
 0x2f3   : > { %2293 = vst.msk [vmem:[%s4603_s16 + $0x90] sm:$0xff] %vm2274_vm3, %v2229_v13  ;;  %v1993_v2 = vadd.f32 %v4591_v11, %v1992_v31  ;;  %v3251_v32 = vpop.f32.mrb[103].mxu0 }
 0x2f5   : > { %v2230_v30 = vmax.f32 %v1993_v2, 0.0 }
 0x2f6   : > { %v1997_v15 = vpop.f32.mrb[104].mxu0 }
 0x2f7   : > { %2294 = vst.msk [vmem:[%s4603_s16 + $0x98] sm:$0xff] %vm2274_vm3, %v2230_v30  ;;  %v1998_v5 = vadd.f32 %v4591_v11, %v1997_v15  ;;  %v3254_v34 = vpop.f32.mrb[105].mxu0 }
 0x2f9   : > { %v2231_v37 = vmax.f32 %v1998_v5, 0.0 }
 0x2fa   : > { %v2002_v38 = vpop.f32.mrb[106].mxu0 }
 0x2fb   : > { %2295 = vst.msk [vmem:[%s4603_s16 + $0xa0] sm:$0xff] %vm2274_vm3, %v2231_v37  ;;  %v2003_v44 = vadd.f32 %v4591_v11, %v2002_v38  ;;  %v3257_v40 = vpop.f32.mrb[107].mxu0 }
 0x2fd   : > { %v2232_v52 = vmax.f32 %v2003_v44, 0.0 }
 0x2fe   : > { %v2007_v41 = vpop.f32.mrb[108].mxu0 }
 0x2ff   : > { %2296 = vst.msk [vmem:[%s4603_s16 + $0xa8] sm:$0xff] %vm2274_vm3, %v2232_v52  ;;  %v2008_v59 = vadd.f32 %v4591_v11, %v2007_v41  ;;  %v3260_v58 = vpop.f32.mrb[109].mxu0 }
 0x301   : > { %v2233_v42 = vmax.f32 %v2008_v59, 0.0 }
 0x302   : > { %v2012_v3 = vpop.f32.mrb[110].mxu0 }
 0x303   : > { %2297 = vst.msk [vmem:[%s4603_s16 + $0xb0] sm:$0xff] %vm2274_vm3, %v2233_v42  ;;  %v2013_v46 = vadd.f32 %v4591_v11, %v2012_v3  ;;  %v3263_v48 = vpop.f32.mrb[111].mxu0 }
 0x305   : > { %v2234_v19 = vmax.f32 %v2013_v46, 0.0 }
 0x306   : > { %v2017_v49 = vpop.f32.mrb[112].mxu0 }
 0x307   : > { %2298 = vst.msk [vmem:[%s4603_s16 + $0xb8] sm:$0xff] %vm2274_vm3, %v2234_v19  ;;  %v2018_v26 = vadd.f32 %v4591_v11, %v2017_v49  ;;  %v3266_v50 = vpop.f32.mrb[113].mxu0 }
 0x309   : > { %v2235_v35 = vmax.f32 %v2018_v26, 0.0 }
 0x30a   : > { %v2022_v54 = vpop.f32.mrb[114].mxu0 }
 0x30b   : > { %2299 = vst.msk [vmem:[%s4603_s16 + $0xc0] sm:$0xff] %vm2274_vm3, %v2235_v35  ;;  %v2023_v43 = vadd.f32 %v4591_v11, %v2022_v54  ;;  %v3269_v55 = vpop.f32.mrb[115].mxu0 }
 0x30d   : > { %v2236_v53 = vmax.f32 %v2023_v43, 0.0 }
 0x30e   : > { %v2027_v60 = vpop.f32.mrb[116].mxu0 }
 0x30f   : > { %2300 = vst.msk [vmem:[%s4603_s16 + $0xc8] sm:$0xff] %vm2274_vm3, %v2236_v53  ;;  %v2028_v61 = vadd.f32 %v4591_v11, %v2027_v60  ;;  %v3272_v4 = vpop.f32.mrb[117].mxu0 }
 0x311   : > { %v2237_v62 = vmax.f32 %v2028_v61, 0.0 }
 0x312   : > { %v2032_v0 = vpop.f32.mrb[118].mxu0 }
 0x313   : > { %2301 = vst.msk [vmem:[%s4603_s16 + $0xd0] sm:$0xff] %vm2274_vm3, %v2237_v62  ;;  %v2033_v1 = vadd.f32 %v4591_v11, %v2032_v0  ;;  %v3275_v8 = vpop.f32.mrb[119].mxu0 }
 0x315   : > { %v2238_v6 = vmax.f32 %v2033_v1, 0.0 }
 0x316   : > { %v2037_v9 = vpop.f32.mrb[120].mxu0 }
 0x317   : > { %2302 = vst.msk [vmem:[%s4603_s16 + $0xd8] sm:$0xff] %vm2274_vm3, %v2238_v6  ;;  %v2038_v10 = vadd.f32 %v4591_v11, %v2037_v9  ;;  %v3278_v12 = vpop.f32.mrb[121].mxu0 }
 0x319   : > { %v2239_v17 = vmax.f32 %v2038_v10, 0.0 }
 0x31a   : > { %v2042_v23 = vpop.f32.mrb[122].mxu0 }
 0x31b   : > { %2303 = vst.msk [vmem:[%s4603_s16 + $0xe0] sm:$0xff] %vm2274_vm3, %v2239_v17  ;;  %v2043_v14 = vadd.f32 %v4591_v11, %v2042_v23  ;;  %v3281_v27 = vpop.f32.mrb[123].mxu0 }
 0x31d   : > { %v2240_v16 = vmax.f32 %v2043_v14, 0.0 }
 0x31e   : > { %v2047_v25 = vpop.f32.mrb[124].mxu0 }
 0x31f   : > { %2304 = vst.msk [vmem:[%s4603_s16 + $0xe8] sm:$0xff] %vm2274_vm3, %v2240_v16  ;;  %v2048_v33 = vadd.f32 %v4591_v11, %v2047_v25  ;;  %v3284_v18 = vpop.f32.mrb[125].mxu0 }
 0x321   : > { %v2241_v39 = vmax.f32 %v2048_v33, 0.0 }
 0x322   : > { %v2052_v20 = vpop.f32.mrb[126].mxu0 }
 0x323   : > { %2305 = vst.msk [vmem:[%s4603_s16 + $0xf0] sm:$0xff] %vm2274_vm3, %v2241_v39  ;;  %v2053_v45 = vadd.f32 %v4591_v11, %v2052_v20  ;;  %v3287_v36 = vpop.f32.mrb[127].mxu0 }
 0x325   : > { %v2242_v21 = vmax.f32 %v2053_v45, 0.0 }
 0x326   : > { %v2057_v51 = vpop.f32.mrb[128].mxu0 }
 0x327   : > { %2306 = vst.msk [vmem:[%s4603_s16 + $0xf8] sm:$0xff] %vm2274_vm3, %v2242_v21  ;;  %v2058_v22 = vadd.f32 %v4591_v11, %v2057_v51  ;;  %v3290_v57 = vpop.f32.mrb[129].mxu0 }
 0x329   : > { %v2243_v47 = vmax.f32 %v2058_v22, 0.0 }
 0x32a   : > { %v2062_v24 = vpop.f32.mrb[130].mxu0 }
 0x32b   : > { %2307 = vst.msk [vmem:[%s4603_s16 + $0x100] sm:$0xff] %vm2274_vm3, %v2243_v47  ;;  %v2063_v63 = vadd.f32 %v4591_v11, %v2062_v24  ;;  %v3293_v28 = vpop.f32.mrb[131].mxu0 }
 0x32d   : > { %v2244_v7 = vmax.f32 %v2063_v63, 0.0 }
 0x32e   : > { %v2067_v29 = vpop.f32.mrb[132].mxu0 }
 0x32f   : > { %2308 = vst.msk [vmem:[%s4603_s16 + $0x108] sm:$0xff] %vm2274_vm3, %v2244_v7  ;;  %v2068_v56 = vadd.f32 %v4591_v11, %v2067_v29  ;;  %v3296_v13 = vpop.f32.mrb[133].mxu0 }
 0x331   : > { %v2245_v31 = vmax.f32 %v2068_v56, 0.0 }
 0x332   : > { %v2072_v2 = vpop.f32.mrb[134].mxu0 }
 0x333   : > { %2309 = vst.msk [vmem:[%s4603_s16 + $0x110] sm:$0xff] %vm2274_vm3, %v2245_v31  ;;  %v2073_v32 = vadd.f32 %v4591_v11, %v2072_v2  ;;  %v3299_v30 = vpop.f32.mrb[135].mxu0 }
 0x335   : > { %v2246_v15 = vmax.f32 %v2073_v32, 0.0 }
 0x336   : > { %v2077_v5 = vpop.f32.mrb[136].mxu0 }
 0x337   : > { %2310 = vst.msk [vmem:[%s4603_s16 + $0x118] sm:$0xff] %vm2274_vm3, %v2246_v15  ;;  %v2078_v34 = vadd.f32 %v4591_v11, %v2077_v5  ;;  %v3302_v37 = vpop.f32.mrb[137].mxu0 }
 0x339   : > { %v2247_v38 = vmax.f32 %v2078_v34, 0.0 }
 0x33a   : > { %v2082_v44 = vpop.f32.mrb[138].mxu0 }
 0x33b   : > { %2311 = vst.msk [vmem:[%s4603_s16 + $0x120] sm:$0xff] %vm2274_vm3, %v2247_v38  ;;  %v2083_v40 = vadd.f32 %v4591_v11, %v2082_v44  ;;  %v3305_v52 = vpop.f32.mrb[139].mxu0 }
 0x33d   : > { %v2248_v41 = vmax.f32 %v2083_v40, 0.0 }
 0x33e   : > { %v2087_v59 = vpop.f32.mrb[140].mxu0 }
 0x33f   : > { %2312 = vst.msk [vmem:[%s4603_s16 + $0x128] sm:$0xff] %vm2274_vm3, %v2248_v41  ;;  %v2088_v58 = vadd.f32 %v4591_v11, %v2087_v59  ;;  %v3308_v42 = vpop.f32.mrb[141].mxu0 }
 0x341   : > { %v2249_v3 = vmax.f32 %v2088_v58, 0.0 }
 0x342   : > { %v2092_v46 = vpop.f32.mrb[142].mxu0 }
 0x343   : > { %2313 = vst.msk [vmem:[%s4603_s16 + $0x130] sm:$0xff] %vm2274_vm3, %v2249_v3  ;;  %v2093_v48 = vadd.f32 %v4591_v11, %v2092_v46  ;;  %v3311_v19 = vpop.f32.mrb[143].mxu0 }
 0x345   : > { %v2250_v49 = vmax.f32 %v2093_v48, 0.0 }
 0x346   : > { %v2097_v26 = vpop.f32.mrb[144].mxu0 }
 0x347   : > { %2314 = vst.msk [vmem:[%s4603_s16 + $0x138] sm:$0xff] %vm2274_vm3, %v2250_v49  ;;  %v2098_v50 = vadd.f32 %v4591_v11, %v2097_v26  ;;  %v3314_v35 = vpop.f32.mrb[145].mxu0 }
 0x349   : > { %v2251_v54 = vmax.f32 %v2098_v50, 0.0 }
 0x34a   : > { %v2102_v43 = vpop.f32.mrb[146].mxu0 }
 0x34b   : > { %2315 = vst.msk [vmem:[%s4603_s16 + $0x140] sm:$0xff] %vm2274_vm3, %v2251_v54  ;;  %v2103_v55 = vadd.f32 %v4591_v11, %v2102_v43  ;;  %v3317_v53 = vpop.f32.mrb[147].mxu0 }
 0x34d   : > { %v2252_v60 = vmax.f32 %v2103_v55, 0.0 }
 0x34e   : > { %v2107_v61 = vpop.f32.mrb[148].mxu0 }
 0x34f   : > { %2316 = vst.msk [vmem:[%s4603_s16 + $0x148] sm:$0xff] %vm2274_vm3, %v2252_v60  ;;  %v2108_v4 = vadd.f32 %v4591_v11, %v2107_v61  ;;  %v3320_v62 = vpop.f32.mrb[149].mxu0 }
 0x351   : > { %v2253_v0 = vmax.f32 %v2108_v4, 0.0 }
 0x352   : > { %v2112_v1 = vpop.f32.mrb[150].mxu0 }
 0x353   : > { %2317 = vst.msk [vmem:[%s4603_s16 + $0x150] sm:$0xff] %vm2274_vm3, %v2253_v0  ;;  %v2113_v8 = vadd.f32 %v4591_v11, %v2112_v1  ;;  %v3323_v6 = vpop.f32.mrb[151].mxu0 }
 0x355   : > { %v2254_v9 = vmax.f32 %v2113_v8, 0.0 }
 0x356   : > { %v2117_v10 = vpop.f32.mrb[152].mxu0 }
 0x357   : > { %2318 = vst.msk [vmem:[%s4603_s16 + $0x158] sm:$0xff] %vm2274_vm3, %v2254_v9  ;;  %v2118_v12 = vadd.f32 %v4591_v11, %v2117_v10  ;;  %v3326_v17 = vpop.f32.mrb[153].mxu0 }
 0x359   : > { %v2255_v23 = vmax.f32 %v2118_v12, 0.0 }
 0x35a   : > { %v2122_v14 = vpop.f32.mrb[154].mxu0 }
 0x35b   : > { %2319 = vst.msk [vmem:[%s4603_s16 + $0x160] sm:$0xff] %vm2274_vm3, %v2255_v23  ;;  %v2123_v27 = vadd.f32 %v4591_v11, %v2122_v14  ;;  %v3329_v16 = vpop.f32.mrb[155].mxu0 }
 0x35d   : > { %v2256_v25 = vmax.f32 %v2123_v27, 0.0 }
 0x35e   : > { %v2127_v33 = vpop.f32.mrb[156].mxu0 }
 0x35f   : > { %2320 = vst.msk [vmem:[%s4603_s16 + $0x168] sm:$0xff] %vm2274_vm3, %v2256_v25  ;;  %v2128_v18 = vadd.f32 %v4591_v11, %v2127_v33  ;;  %v3332_v39 = vpop.f32.mrb[157].mxu0 }
 0x361   : > { %v2257_v20 = vmax.f32 %v2128_v18, 0.0 }
 0x362   : > { %v2132_v45 = vpop.f32.mrb[158].mxu0 }
 0x363   : > { %2321 = vst.msk [vmem:[%s4603_s16 + $0x170] sm:$0xff] %vm2274_vm3, %v2257_v20  ;;  %v2133_v36 = vadd.f32 %v4591_v11, %v2132_v45  ;;  %v3335_v21 = vpop.f32.mrb[159].mxu0 }
 0x365   : > { %v2258_v51 = vmax.f32 %v2133_v36, 0.0 }
 0x366   : > { %v2137_v22 = vpop.f32.mrb[160].mxu0 }
 0x367   : > { %2322 = vst.msk [vmem:[%s4603_s16 + $0x178] sm:$0xff] %vm2274_vm3, %v2258_v51  ;;  %v2138_v57 = vadd.f32 %v4591_v11, %v2137_v22  ;;  %v3338_v47 = vpop.f32.mrb[161].mxu0 }
 0x369   : > { %v2259_v24 = vmax.f32 %v2138_v57, 0.0 }
 0x36a   : > { %v2142_v63 = vpop.f32.mrb[162].mxu0 }
 0x36b   : > { %2323 = vst.msk [vmem:[%s4603_s16 + $0x180] sm:$0xff] %vm2274_vm3, %v2259_v24  ;;  %v2143_v28 = vadd.f32 %v4591_v11, %v2142_v63  ;;  %v3341_v7 = vpop.f32.mrb[163].mxu0 }
 0x36d   : > { %v2260_v29 = vmax.f32 %v2143_v28, 0.0 }
 0x36e   : > { %v2147_v56 = vpop.f32.mrb[164].mxu0 }
 0x36f   : > { %2324 = vst.msk [vmem:[%s4603_s16 + $0x188] sm:$0xff] %vm2274_vm3, %v2260_v29  ;;  %v2148_v13 = vadd.f32 %v4591_v11, %v2147_v56  ;;  %v3344_v31 = vpop.f32.mrb[165].mxu0 }
 0x371   : > { %v2261_v2 = vmax.f32 %v2148_v13, 0.0 }
 0x372   : > { %v2152_v32 = vpop.f32.mrb[166].mxu0 }
 0x373   : > { %2325 = vst.msk [vmem:[%s4603_s16 + $0x190] sm:$0xff] %vm2274_vm3, %v2261_v2  ;;  %v2153_v30 = vadd.f32 %v4591_v11, %v2152_v32  ;;  %v3347_v15 = vpop.f32.mrb[167].mxu0 }
 0x375   : > { %v2262_v5 = vmax.f32 %v2153_v30, 0.0 }
 0x376   : > { %v2157_v34 = vpop.f32.mrb[168].mxu0 }
 0x377   : > { %2326 = vst.msk [vmem:[%s4603_s16 + $0x198] sm:$0xff] %vm2274_vm3, %v2262_v5  ;;  %v2158_v37 = vadd.f32 %v4591_v11, %v2157_v34  ;;  %v3350_v38 = vpop.f32.mrb[169].mxu0 }
 0x379   : > { %v2263_v44 = vmax.f32 %v2158_v37, 0.0 }
 0x37a   : > { %v2162_v40 = vpop.f32.mrb[170].mxu0 }
 0x37b   : > { %2327 = vst.msk [vmem:[%s4603_s16 + $0x1a0] sm:$0xff] %vm2274_vm3, %v2263_v44  ;;  %v2163_v52 = vadd.f32 %v4591_v11, %v2162_v40  ;;  %v3353_v41 = vpop.f32.mrb[171].mxu0 }
 0x37d   : > { %v2264_v59 = vmax.f32 %v2163_v52, 0.0 }
 0x37e   : > { %v2167_v58 = vpop.f32.mrb[172].mxu0 }
 0x37f   : > { %2328 = vst.msk [vmem:[%s4603_s16 + $0x1a8] sm:$0xff] %vm2274_vm3, %v2264_v59  ;;  %v2168_v42 = vadd.f32 %v4591_v11, %v2167_v58  ;;  %v3356_v3 = vpop.f32.mrb[173].mxu0 }
 0x381   : > { %v2265_v46 = vmax.f32 %v2168_v42, 0.0 }
 0x382   : > { %v2172_v48 = vpop.f32.mrb[174].mxu0 }
 0x383   : > { %2329 = vst.msk [vmem:[%s4603_s16 + $0x1b0] sm:$0xff] %vm2274_vm3, %v2265_v46  ;;  %v2173_v19 = vadd.f32 %v4591_v11, %v2172_v48  ;;  %v3359_v49 = vpop.f32.mrb[175].mxu0 }
 0x385   : > { %v2266_v26 = vmax.f32 %v2173_v19, 0.0 }
 0x386   : > { %v2177_v50 = vpop.f32.mrb[176].mxu0 }
 0x387   : > { %2330 = vst.msk [vmem:[%s4603_s16 + $0x1b8] sm:$0xff] %vm2274_vm3, %v2266_v26  ;;  %v2178_v35 = vadd.f32 %v4591_v11, %v2177_v50  ;;  %v3362_v54 = vpop.f32.mrb[177].mxu0 }
 0x389   : > { %v2267_v43 = vmax.f32 %v2178_v35, 0.0 }
 0x38a   : > { %v2182_v55 = vpop.f32.mrb[178].mxu0 }
 0x38b   : > { %2331 = vst.msk [vmem:[%s4603_s16 + $0x1c0] sm:$0xff] %vm2274_vm3, %v2267_v43  ;;  %v2183_v53 = vadd.f32 %v4591_v11, %v2182_v55  ;;  %v3365_v60 = vpop.f32.mrb[179].mxu0 }
 0x38d   : > { %v2268_v61 = vmax.f32 %v2183_v53, 0.0 }
 0x38e   : > { %v2187_v4 = vpop.f32.mrb[180].mxu0 }
 0x38f   : > { %2332 = vst.msk [vmem:[%s4603_s16 + $0x1c8] sm:$0xff] %vm2274_vm3, %v2268_v61  ;;  %v2188_v62 = vadd.f32 %v4591_v11, %v2187_v4  ;;  %v3368_v0 = vpop.f32.mrb[181].mxu0 }
 0x391   : > { %v2269_v1 = vmax.f32 %v2188_v62, 0.0 }
 0x392   : > { %v2192_v8 = vpop.f32.mrb[182].mxu0 }
 0x393   : > { %2333 = vst.msk [vmem:[%s4603_s16 + $0x1d0] sm:$0xff] %vm2274_vm3, %v2269_v1  ;;  %v2193_v6 = vadd.f32 %v4591_v11, %v2192_v8  ;;  %v3371_v9 = vpop.f32.mrb[183].mxu0 }
 0x395   : > { %v2270_v10 = vmax.f32 %v2193_v6, 0.0 }
 0x396   : > { %v2197_v12 = vpop.f32.mrb[184].mxu0 }
 0x397   : > { %2334 = vst.msk [vmem:[%s4603_s16 + $0x1d8] sm:$0xff] %vm2274_vm3, %v2270_v10  ;;  %v2198_v17 = vadd.f32 %v4591_v11, %v2197_v12  ;;  %v3374_v23 = vpop.f32.mrb[185].mxu0 }
 0x399   : > { %v2271_v14 = vmax.f32 %v2198_v17, 0.0 }
 0x39a   : > { %v2202_v27 = vpop.f32.mrb[186].mxu0 }
 0x39b   : > { %2335 = vst.msk [vmem:[%s4603_s16 + $0x1e0] sm:$0xff] %vm2274_vm3, %v2271_v14  ;;  %v2203_v16 = vadd.f32 %v4591_v11, %v2202_v27  ;;  %v3377_v25 = vpop.f32.mrb[187].mxu0 }
 0x39d   : > { %v2272_v33 = vmax.f32 %v2203_v16, 0.0 }
 0x39e   : > { %v2207_v18 = vpop.f32.mrb[188].mxu0 }
 0x39f   : > { %2336 = vst.msk [vmem:[%s4603_s16 + $0x1e8] sm:$0xff] %vm2274_vm3, %v2272_v33  ;;  %v2208_v39 = vadd.f32 %v4591_v11, %v2207_v18  ;;  %v3380_v20 = vpop.f32.mrb[189].mxu0 }
 0x3a1   : > { %v2273_v45 = vmax.f32 %v2208_v39, 0.0 }
 0x3a3   : > { %2337 = vst.msk [vmem:[%s4603_s16 + $0x1f0] sm:$0xff] %vm2274_vm3, %v2273_v45 }
 0x3a4 PF: > { %s17_s24 = sadd.s32 1, %s3667_s24  }
 0x3a5   : > { %p14_p4 = scmp.ge.s32.totalorder %s17_s24, 4  }
 0x3a7   :  { %16 = sbr.rel (!%p14_p4) target bundleno = 1 (0x1), region = 78 }

</bundles_post_ra>
